<compile_context>
chip_gen: v7x
topology: tpu7x:2x2x1
jax: 0.10.0
libtpu: 0.0.40
codegen_flags: <defaults>
</compile_context>

<pallas_src>
import math
from functools import partial

import jax
import jax.numpy as jnp
from jax.experimental import pallas as pl
from jax.experimental.pallas import tpu as pltpu


# ----------------------------------------------------------------------------
# Helpers
# ----------------------------------------------------------------------------
def _round_up(v, m):
    return ((v + m - 1) // m) * m


def _largest_divisor_tile(dim, cap, mult):
    """Largest multiple of `mult` <= cap dividing `dim` (assumes dim % mult == 0)."""
    t = min(cap, dim)
    t -= t % mult
    while dim % t:
        t -= mult
    return t


# ----------------------------------------------------------------------------
# Pallas kernels
# ----------------------------------------------------------------------------
def _conv_row_kernel(*refs, kh, kw, cp, wo, alpha, res_scale, has_shortcut):
    """One output row of a (kh x kw) stride-1 conv, all taps fused in one step.

    refs = (a_0 .. a_{kh-1}, w, bias[, shortcut], out) with
      a_dh     : (Wp, Cp)        bf16  padded input row h + dh
      w        : (kh*kw*Cp, tn)  bf16  full weight, VMEM-resident (DMA'd once)
      bias     : (1, tn)         f32
      shortcut : (wo, tn)        bf16  (optional)
      out      : (wo, tn)        out dtype
    out = (sum_{dh,dw} leaky(a_dh)[dw:dw+wo] @ w[(dh*kw+dw)*Cp : +Cp]
           + bias [+ shortcut]) * res_scale
    """
    a_refs = refs[:kh]
    w_ref, bias_ref = refs[kh], refs[kh + 1]
    if has_shortcut:
        s_ref, o_ref = refs[kh + 2], refs[kh + 3]
    else:
        o_ref = refs[kh + 2]

    acc = jnp.zeros(o_ref.shape, jnp.float32)
    for dh in range(kh):
        a = a_refs[dh][...]                               # (Wp, Cp) bf16
        if alpha is not None:
            # LeakyReLU on the conv *input*, applied once per loaded row.
            # Zero padding rows/channels map to zero -> exactly equivalent to
            # activating before padding.
            a = jnp.where(a >= 0, a, alpha * a)
        for dw in range(kw):
            k0 = (dh * kw + dw) * cp                      # static, 128-aligned
            acc += jnp.dot(a[dw:dw + wo, :], w_ref[pl.ds(k0, cp), :],
                           preferred_element_type=jnp.float32)
    r = acc + bias_ref[...]
    if has_shortcut:
        r = r + s_ref[...].astype(jnp.float32)
    if res_scale != 1.0:
        r = r * res_scale
    o_ref[...] = r.astype(o_ref.dtype)


def _avgpool2x2_kernel(x_ref, o_ref, *, cp):
    """x block: (bm, 2, Wo, 2*Cp) -> o block: (bm, Wo, Cp); mean of 2x2 windows."""
    x = x_ref[...].astype(jnp.float32)
    s = x[:, 0] + x[:, 1]                                 # reduce row pair (dh)
    o_ref[...] = ((s[..., :cp] + s[..., cp:]) * 0.25).astype(o_ref.dtype)


# ----------------------------------------------------------------------------
# Wrappers
# ----------------------------------------------------------------------------
def pack_conv(w, b=None):
    """(KH,KW,Cin,Cout) HWIO -> lane-padded bf16 (KH*KW*Cp, Np) weight + f32 (1, Np) bias."""
    kh, kw, cin, cout = w.shape
    cp, np_ = _round_up(cin, 128), _round_up(cout, 128)
    w_p = jnp.pad(w, ((0, 0), (0, 0), (0, cp - cin), (0, np_ - cout)))
    w_p = w_p.astype(jnp.bfloat16).reshape(kh * kw * cp, np_)
    if b is None:
        b = jnp.zeros((cout,), jnp.float32)
    b_p = jnp.pad(b.astype(jnp.float32), (0, np_ - cout)).reshape(1, np_)
    return dict(w_p=w_p, b_p=b_p, kh=kh, kw=kw, cin=cin, cout=cout, Cp=cp, Np=np_)


def conv2d_rows(x, pk, *, pad, alpha=None, shortcut=None, res_scale=1.0,
                out_dtype=jnp.bfloat16):
    """NHWC stride-1 conv with implicit im2col; one output row per grid step.

    x        : (N, H, W, Cp) bf16, channels already lane-padded (Cp % 128 == 0).
    alpha    : fuse LeakyReLU(alpha) applied to the conv input (prologue).
    shortcut : (N, Ho, Wo, Np) bf16 added in the epilogue, then * res_scale.
    Returns  : (N, Ho, Wo, Np) `out_dtype`; padded output channels stay zero.
    """
    kh, kw, cp, np_ = pk["kh"], pk["kw"], pk["Cp"], pk["Np"]
    n, h, w, c = x.shape
    assert c == cp, (c, cp)
    if pad:
        x = jnp.pad(x, ((0, 0), (pad, pad), (pad, pad), (0, 0)))
    hp, wp = h + 2 * pad, w + 2 * pad
    ho, wo = hp - kh + 1, wp - kw + 1

    # tn == Np (<= 512) keeps the whole weight resident in VMEM with a constant
    # block index -> exactly one weight DMA; naturally a 256-multiple on
    # v6e/v7x whenever Cout >= 256.
    tn = np_ if np_ <= 512 else _largest_divisor_tile(np_, 512, 128)
    j_steps = np_ // tn

    inputs, in_specs = [], []
    for dh in range(kh):      # shifted row windows of the padded activation
        inputs.append(x)
        in_specs.append(pl.BlockSpec(
            (None, None, wp, cp),
            lambda ni, hi, ji, dh=dh: (ni, hi + dh, 0, 0)))
    inputs.append(pk["w_p"])
    in_specs.append(pl.BlockSpec((kh * kw * cp, tn), lambda ni, hi, ji: (0, ji)))
    inputs.append(pk["b_p"])
    in_specs.append(pl.BlockSpec((1, tn), lambda ni, hi, ji: (0, ji)))
    has_short = shortcut is not None
    if has_short:
        inputs.append(shortcut)
        in_specs.append(pl.BlockSpec((None, None, wo, tn),
                                     lambda ni, hi, ji: (ni, hi, 0, ji)))

    return pl.pallas_call(
        partial(_conv_row_kernel, kh=kh, kw=kw, cp=cp, wo=wo, alpha=alpha,
                res_scale=res_scale, has_shortcut=has_short),
        out_shape=jax.ShapeDtypeStruct((n, ho, wo, np_), out_dtype),
        grid=(n, ho, j_steps),
        in_specs=in_specs,
        out_specs=pl.BlockSpec((None, None, wo, tn),
                               lambda ni, hi, ji: (ni, hi, 0, ji)),
        compiler_params=pltpu.CompilerParams(
            dimension_semantics=("parallel", "parallel", "arbitrary")),
    )(*inputs)


def avg_pool2x2(x):
    """x: (N, H, W, Cp) -> (N, H//2, W//2, Cp); F.avg_pool2d(x, 2) equivalent.

    Single-read Pallas kernel over the pure reshape (N*Ho, 2, Wo, 2*Cp); Cp is
    lane-padded so input and output stay lane-dense (unmasked stores).
    """
    n, h, w, cp = x.shape
    assert h % 2 == 0 and w % 2 == 0, "avg_pool2x2 requires even H and W"
    ho, wo = h // 2, w // 2
    m = n * ho
    xr = x.reshape(m, 2, wo, 2 * cp)                 # pure reshape, no data movement
    # Block rows chosen by VMEM budget (~2 MiB per input block), not divisor luck.
    row_bytes = 2 * wo * 2 * cp * x.dtype.itemsize
    cap = max(1, (2 << 20) // row_bytes)
    bm = max(d for d in range(1, min(m, cap) + 1) if m % d == 0)
    out = pl.pallas_call(
        partial(_avgpool2x2_kernel, cp=cp),
        out_shape=jax.ShapeDtypeStruct((m, wo, cp), x.dtype),
        grid=(m // bm,),
        in_specs=[pl.BlockSpec((bm, 2, wo, 2 * cp), lambda i: (i, 0, 0, 0))],
        out_specs=pl.BlockSpec((bm, wo, cp), lambda i: (i, 0, 0)),
        compiler_params=pltpu.CompilerParams(dimension_semantics=("parallel",)),
    )(xr)
    return out.reshape(n, ho, wo, cp)


# ----------------------------------------------------------------------------
# ResBlk forward (matches the PyTorch module semantics)
# ----------------------------------------------------------------------------
def resblk_forward(pk, x, *, downsample=True, normalize=False, alpha=0.2):
    """x: (N, H, W, Cin) NHWC -> (N, H', W', Cout) f32."""
    if normalize:
        # TODO(synk): InstanceNorm2d (normalize=True) path not implemented; the
        # reference ResBlk defaults to normalize=False.
        raise NotImplementedError("normalize=True (InstanceNorm2d) not implemented")
    n, h, w, cin = x.shape
    cp_in = pk["conv1"]["Cp"]
    # One-time prep: bf16 + lane-padded channels, carried through every kernel.
    xc = jnp.pad(x.astype(jnp.bfloat16), ((0, 0),) * 3 + ((0, cp_in - cin),))

    # Shortcut: pool first, then learned 1x1 conv (they commute; 4x fewer rows).
    s = avg_pool2x2(xc) if downsample else xc
    if pk.get("conv1x1") is not None:                   # learned_sc (dim_in != dim_out)
        s = conv2d_rows(s, pk["conv1x1"], pad=0, out_dtype=jnp.bfloat16)

    # Residual: actv -> conv1 -> pool -> actv -> conv2; activations fused as
    # prologues, shortcut add + 1/sqrt(2) fused into conv2's epilogue.
    r = conv2d_rows(xc, pk["conv1"], pad=1, alpha=alpha, out_dtype=jnp.bfloat16)
    if downsample:
        r = avg_pool2x2(r)
    # TODO(synk): the pool above could additionally be fused into conv2's row
    # prologue to remove one HBM round trip of the conv1 output.
    y = conv2d_rows(r, pk["conv2"], pad=1, alpha=alpha, shortcut=s,
                    res_scale=1.0 / math.sqrt(2.0), out_dtype=jnp.float32)
    return y[..., :pk["conv2"]["cout"]]                 # drop padded channels once


def resblk_apply(pk, x_nchw, **kw):
    x = jnp.transpose(x_nchw, (0, 2, 3, 1))             # PyTorch NCHW -> NHWC
    y = resblk_forward(pk, x, **kw)
    return jnp.transpose(y, (0, 3, 1, 2))               # back to NCHW


# ----------------------------------------------------------------------------
# Params, pure-JAX reference, demo
# ----------------------------------------------------------------------------
def init_resblk(key, dim_in, dim_out):
    ks = jax.random.split(key, 5)

    def u(k, shape, fan_in):
        bound = 1.0 / math.sqrt(fan_in)
        return jax.random.uniform(k, shape, jnp.float32, -bound, bound)

    return {
        "conv1_w": u(ks[0], (3, 3, dim_in, dim_in), 9 * dim_in),
        "conv1_b": u(ks[1], (dim_in,), 9 * dim_in),
        "conv2_w": u(ks[2], (3, 3, dim_in, dim_out), 9 * dim_in),
        "conv2_b": u(ks[3], (dim_out,), 9 * dim_in),
        "conv1x1_w": (u(ks[4], (1, 1, dim_in, dim_out), dim_in)
                      if dim_in != dim_out else None),
    }


def pack_resblk(raw):
    return {
        "conv1": pack_conv(raw["conv1_w"], raw["conv1_b"]),
        "conv2": pack_conv(raw["conv2_w"], raw["conv2_b"]),
        "conv1x1": (pack_conv(raw["conv1x1_w"])
                    if raw.get("conv1x1_w") is not None else None),
    }


def resblk_reference(raw, x_nchw, alpha=0.2):
    """Pure-JAX f32 reference of PyTorch ResBlk (normalize=False, downsample=True)."""
    x = jnp.transpose(x_nchw, (0, 2, 3, 1))

    def conv(t, w, b, pad):
        out = jax.lax.conv_general_dilated(
            t, w, window_strides=(1, 1), padding=[(pad, pad), (pad, pad)],
            dimension_numbers=("NHWC", "HWIO", "NHWC"))
        return out if b is None else out + b

    def pool(t):
        n, h, w_, c = t.shape
        return t.reshape(n, h // 2, 2, w_ // 2, 2, c).mean(axis=(2, 4))

    def lrelu(t):
        return jnp.where(t >= 0, t, alpha * t)

    s = x
    if raw.get("conv1x1_w") is not None:
        s = conv(s, raw["conv1x1_w"], None, 0)
    s = pool(s)
    r = conv(lrelu(x), raw["conv1_w"], raw["conv1_b"], 1)
    r = pool(r)
    r = conv(lrelu(r), raw["conv2_w"], raw["conv2_b"], 1)
    y = (s + r) / math.sqrt(2.0)
    return jnp.transpose(y, (0, 3, 1, 2))


if __name__ == "__main__":
    DIM_IN, DIM_OUT, IMG, BATCH = 64, 128, 16, 2    # learned_sc + downsample ResBlk

    root = jax.random.PRNGKey(0)
    k_params, k_x = jax.random.split(root)
    raw = init_resblk(k_params, DIM_IN, DIM_OUT)
    packed = pack_resblk(raw)
    x = jax.random.normal(k_x, (BATCH, DIM_IN, IMG, IMG), jnp.float32)

    fwd = jax.jit(lambda xx: resblk_apply(packed, xx))
    out = jax.block_until_ready(fwd(x))
    assert out.shape == (BATCH, DIM_OUT, IMG // 2, IMG // 2), out.shape

    ref = resblk_reference(raw, x)
    max_err = float(jnp.max(jnp.abs(out - ref)))
    assert jnp.allclose(out, ref, rtol=5e-2, atol=5e-2), f"max abs err {max_err}"
    print("KERNEL_OK")
</pallas_src>

<mosaic_0001>
module attributes {stable_mosaic.version = 11 : i64} {
  func.func @_avgpool2x2_kernel(%arg0: i32, %arg1: memref<16x2x8x256xbf16, #tpu.memory_space<vmem>>, %arg2: memref<16x8x128xbf16, #tpu.memory_space<vmem>>) attributes {dimension_semantics = [#tpu.dimension_semantics<parallel>], iteration_bounds = array<i64: 1>, scalar_prefetch = 0 : i64, scratch_operands = 0 : i64, tpu.core_type = #tpu.core_type<tc>, window_params = [{transform_indices = @transform_0, window_bounds = array<i64: 16, 2, 8, 256>}, {transform_indices = @transform_1, window_bounds = array<i64: 16, 8, 128>}]} {
    %c0 = arith.constant 0 : index
    %c0_0 = arith.constant 0 : index
    %c0_1 = arith.constant 0 : index
    %c0_2 = arith.constant 0 : index
    %0 = vector.load %arg1[%c0, %c0_0, %c0_1, %c0_2] : memref<16x2x8x256xbf16, #tpu.memory_space<vmem>>, vector<16x2x8x256xbf16>
    %1 = arith.extf %0 : vector<16x2x8x256xbf16> to vector<16x2x8x256xf32>
    %2 = vector.extract_strided_slice %1 {offsets = [0, 0, 0, 0], sizes = [16, 1, 8, 256], strides = [1, 1, 1, 1]} : vector<16x2x8x256xf32> to vector<16x1x8x256xf32>
    %3 = vector.shape_cast %2 : vector<16x1x8x256xf32> to vector<16x8x256xf32>
    %4 = vector.extract_strided_slice %1 {offsets = [0, 1, 0, 0], sizes = [16, 1, 8, 256], strides = [1, 1, 1, 1]} : vector<16x2x8x256xf32> to vector<16x1x8x256xf32>
    %5 = vector.shape_cast %4 : vector<16x1x8x256xf32> to vector<16x8x256xf32>
    %6 = arith.addf %3, %5 : vector<16x8x256xf32>
    %7 = vector.extract_strided_slice %6 {offsets = [0, 0, 0], sizes = [16, 8, 128], strides = [1, 1, 1]} : vector<16x8x256xf32> to vector<16x8x128xf32>
    %8 = vector.extract_strided_slice %6 {offsets = [0, 0, 128], sizes = [16, 8, 128], strides = [1, 1, 1]} : vector<16x8x256xf32> to vector<16x8x128xf32>
    %9 = arith.addf %7, %8 : vector<16x8x128xf32>
    %cst = arith.constant 2.500000e-01 : f32
    %10 = vector.broadcast %cst : f32 to vector<16x8x128xf32>
    %11 = arith.mulf %9, %10 : vector<16x8x128xf32>
    %12 = arith.truncf %11 : vector<16x8x128xf32> to vector<16x8x128xbf16>
    %c0_3 = arith.constant 0 : index
    %c0_4 = arith.constant 0 : index
    %c0_5 = arith.constant 0 : index
    %13 = vector.load %arg2[%c0_3, %c0_4, %c0_5] : memref<16x8x128xbf16, #tpu.memory_space<vmem>>, vector<16x8x128xbf16>
    tpu.vector_store %arg2[%c0_3, %c0_4, %c0_5], %12 {strides = array<i32>} : memref<16x8x128xbf16, #tpu.memory_space<vmem>>, vector<16x8x128xbf16>,
    return
  }
  func.func @transform_0(%arg0: i32) -> (i32, i32, i32, i32) {
    %c0_i32 = arith.constant 0 : i32
    %c0_i32_0 = arith.constant 0 : i32
    %c0_i32_1 = arith.constant 0 : i32
    %c0_i32_2 = arith.constant 0 : i32
    return %arg0, %c0_i32, %c0_i32_0, %c0_i32_1 : i32, i32, i32, i32
  }
  func.func @transform_1(%arg0: i32) -> (i32, i32, i32) {
    %c0_i32 = arith.constant 0 : i32
    %c0_i32_0 = arith.constant 0 : i32
    %c0_i32_1 = arith.constant 0 : i32
    return %arg0, %c0_i32, %c0_i32_0 : i32, i32, i32
  }
}

module attributes {stable_mosaic.version = 11 : i64} {
  func.func @_conv_row_kernel(%arg0: i32, %arg1: i32, %arg2: i32, %arg3: memref<1x1x8x128xbf16, #tpu.memory_space<vmem>>, %arg4: memref<128x128xbf16, #tpu.memory_space<vmem>>, %arg5: memref<1x128xf32, #tpu.memory_space<vmem>>, %arg6: memref<1x1x8x128xbf16, #tpu.memory_space<vmem>>) attributes {dimension_semantics = [#tpu.dimension_semantics<parallel>, #tpu.dimension_semantics<parallel>, #tpu.dimension_semantics<arbitrary>], iteration_bounds = array<i64: 2, 8, 1>, scalar_prefetch = 0 : i64, scratch_operands = 0 : i64, tpu.core_type = #tpu.core_type<tc>, window_params = [{transform_indices = @transform_0, window_bounds = array<i64: 1, 1, 8, 128>}, {transform_indices = @transform_1, window_bounds = array<i64: 128, 128>}, {transform_indices = @transform_2, window_bounds = array<i64: 1, 128>}, {transform_indices = @transform_3, window_bounds = array<i64: 1, 1, 8, 128>}]} {
    %cst = arith.constant 0.000000e+00 : f32
    %0 = vector.broadcast %cst : f32 to vector<8x128xf32>
    %c0 = arith.constant 0 : index
    %c0_0 = arith.constant 0 : index
    %c0_1 = arith.constant 0 : index
    %c0_2 = arith.constant 0 : index
    %1 = vector.load %arg3[%c0, %c0_0, %c0_1, %c0_2] : memref<1x1x8x128xbf16, #tpu.memory_space<vmem>>, vector<1x1x8x128xbf16>
    %2 = vector.shape_cast %1 : vector<1x1x8x128xbf16> to vector<8x128xbf16>
    %c0_3 = arith.constant 0 : index
    %c0_4 = arith.constant 0 : index
    %3 = vector.load %arg4[%c0_3, %c0_4] : memref<128x128xbf16, #tpu.memory_space<vmem>>, vector<128x128xbf16>
    %cst_5 = arith.constant dense<0.000000e+00> : vector<8x128xf32>
    %4 = tpu.matmul %2, %3, %cst_5 {dimension_numbers = #tpu.dot_dimension_numbers<[1], [0], [0], [1], [0, 0, 1, 1], [], []>} : vector<8x128xbf16>, vector<128x128xbf16>, vector<8x128xf32> -> vector<8x128xf32>
    %5 = arith.addf %0, %4 : vector<8x128xf32>
    %c0_6 = arith.constant 0 : index
    %c0_7 = arith.constant 0 : index
    %6 = vector.load %arg5[%c0_6, %c0_7] : memref<1x128xf32, #tpu.memory_space<vmem>>, vector<1x128xf32>
    %7 = vector.broadcast %6 : vector<1x128xf32> to vector<8x128xf32>
    %8 = arith.addf %5, %7 : vector<8x128xf32>
    %9 = arith.truncf %8 : vector<8x128xf32> to vector<8x128xbf16>
    %c0_8 = arith.constant 0 : index
    %c0_9 = arith.constant 0 : index
    %c0_10 = arith.constant 0 : index
    %c0_11 = arith.constant 0 : index
    %10 = vector.load %arg6[%c0_8, %c0_9, %c0_10, %c0_11] : memref<1x1x8x128xbf16, #tpu.memory_space<vmem>>, vector<1x1x8x128xbf16>
    %11 = vector.shape_cast %10 : vector<1x1x8x128xbf16> to vector<8x128xbf16>
    %12 = vector.shape_cast %9 : vector<8x128xbf16> to vector<1x1x8x128xbf16>
    tpu.vector_store %arg6[%c0_8, %c0_9, %c0_10, %c0_11], %12 {strides = array<i32>} : memref<1x1x8x128xbf16, #tpu.memory_space<vmem>>, vector<1x1x8x128xbf16>,
    return
  }
  func.func @transform_0(%arg0: i32, %arg1: i32, %arg2: i32) -> (i32, i32, i32, i32) {
    %c0_i32 = arith.constant 0 : i32
    %0 = arith.addi %arg1, %c0_i32 : i32
    %c0_i32_0 = arith.constant 0 : i32
    %c0_i32_1 = arith.constant 0 : i32
    %c0_i32_2 = arith.constant 0 : i32
    return %arg0, %0, %c0_i32_0, %c0_i32_1 : i32, i32, i32, i32
  }
  func.func @transform_1(%arg0: i32, %arg1: i32, %arg2: i32) -> (i32, i32) {
    %c0_i32 = arith.constant 0 : i32
    %c0_i32_0 = arith.constant 0 : i32
    return %c0_i32, %arg2 : i32, i32
  }
  func.func @transform_2(%arg0: i32, %arg1: i32, %arg2: i32) -> (i32, i32) {
    %c0_i32 = arith.constant 0 : i32
    %c0_i32_0 = arith.constant 0 : i32
    return %c0_i32, %arg2 : i32, i32
  }
  func.func @transform_3(%arg0: i32, %arg1: i32, %arg2: i32) -> (i32, i32, i32, i32) {
    %c0_i32 = arith.constant 0 : i32
    %c0_i32_0 = arith.constant 0 : i32
    return %arg0, %arg1, %c0_i32, %arg2 : i32, i32, i32, i32
  }
}

module attributes {stable_mosaic.version = 11 : i64} {
  func.func @_conv_row_kernel(%arg0: i32, %arg1: i32, %arg2: i32, %arg3: memref<1x1x18x128xbf16, #tpu.memory_space<vmem>>, %arg4: memref<1x1x18x128xbf16, #tpu.memory_space<vmem>>, %arg5: memref<1x1x18x128xbf16, #tpu.memory_space<vmem>>, %arg6: memref<1152x128xbf16, #tpu.memory_space<vmem>>, %arg7: memref<1x128xf32, #tpu.memory_space<vmem>>, %arg8: memref<1x1x16x128xbf16, #tpu.memory_space<vmem>>) attributes {dimension_semantics = [#tpu.dimension_semantics<parallel>, #tpu.dimension_semantics<parallel>, #tpu.dimension_semantics<arbitrary>], iteration_bounds = array<i64: 2, 16, 1>, scalar_prefetch = 0 : i64, scratch_operands = 0 : i64, tpu.core_type = #tpu.core_type<tc>, window_params = [{transform_indices = @transform_0, window_bounds = array<i64: 1, 1, 18, 128>}, {transform_indices = @transform_1, window_bounds = array<i64: 1, 1, 18, 128>}, {transform_indices = @transform_2, window_bounds = array<i64: 1, 1, 18, 128>}, {transform_indices = @transform_3, window_bounds = array<i64: 1152, 128>}, {transform_indices = @transform_4, window_bounds = array<i64: 1, 128>}, {transform_indices = @transform_5, window_bounds = array<i64: 1, 1, 16, 128>}]} {
    %cst = arith.constant 0.000000e+00 : f32
    %0 = vector.broadcast %cst : f32 to vector<16x128xf32>
    %c0 = arith.constant 0 : index
    %c0_0 = arith.constant 0 : index
    %c0_1 = arith.constant 0 : index
    %c0_2 = arith.constant 0 : index
    %1 = vector.load %arg3[%c0, %c0_0, %c0_1, %c0_2] : memref<1x1x18x128xbf16, #tpu.memory_space<vmem>>, vector<1x1x18x128xbf16>
    %2 = vector.shape_cast %1 : vector<1x1x18x128xbf16> to vector<18x128xbf16>
    %cst_3 = arith.constant 0.000000e+00 : bf16
    %3 = vector.broadcast %cst_3 : bf16 to vector<18x128xbf16>
    %4 = arith.cmpf oge, %2, %3 : vector<18x128xbf16>
    %cst_4 = arith.constant 2.001950e-01 : bf16
    %5 = vector.broadcast %cst_4 : bf16 to vector<18x128xbf16>
    %6 = arith.mulf %5, %2 : vector<18x128xbf16>
    %7 = arith.select %4, %2, %6 : vector<18x128xi1>, vector<18x128xbf16>
    %8 = vector.extract_strided_slice %7 {offsets = [0, 0], sizes = [16, 128], strides = [1, 1]} : vector<18x128xbf16> to vector<16x128xbf16>
    %c0_5 = arith.constant 0 : index
    %c0_6 = arith.constant 0 : index
    %9 = vector.load %arg6[%c0_5, %c0_6] : memref<1152x128xbf16, #tpu.memory_space<vmem>>, vector<128x128xbf16>
    %cst_7 = arith.constant dense<0.000000e+00> : vector<16x128xf32>
    %10 = tpu.matmul %8, %9, %cst_7 {dimension_numbers = #tpu.dot_dimension_numbers<[1], [0], [0], [1], [0, 0, 1, 1], [], []>} : vector<16x128xbf16>, vector<128x128xbf16>, vector<16x128xf32> -> vector<16x128xf32>
    %11 = arith.addf %0, %10 : vector<16x128xf32>
    %12 = vector.extract_strided_slice %7 {offsets = [1, 0], sizes = [16, 128], strides = [1, 1]} : vector<18x128xbf16> to vector<16x128xbf16>
    %c128 = arith.constant 128 : index
    %c0_8 = arith.constant 0 : index
    %13 = vector.load %arg6[%c128, %c0_8] : memref<1152x128xbf16, #tpu.memory_space<vmem>>, vector<128x128xbf16>
    %cst_9 = arith.constant dense<0.000000e+00> : vector<16x128xf32>
    %14 = tpu.matmul %12, %13, %cst_9 {dimension_numbers = #tpu.dot_dimension_numbers<[1], [0], [0], [1], [0, 0, 1, 1], [], []>} : vector<16x128xbf16>, vector<128x128xbf16>, vector<16x128xf32> -> vector<16x128xf32>
    %15 = arith.addf %11, %14 : vector<16x128xf32>
    %16 = vector.extract_strided_slice %7 {offsets = [2, 0], sizes = [16, 128], strides = [1, 1]} : vector<18x128xbf16> to vector<16x128xbf16>
    %c256 = arith.constant 256 : index
    %c0_10 = arith.constant 0 : index
    %17 = vector.load %arg6[%c256, %c0_10] : memref<1152x128xbf16, #tpu.memory_space<vmem>>, vector<128x128xbf16>
    %cst_11 = arith.constant dense<0.000000e+00> : vector<16x128xf32>
    %18 = tpu.matmul %16, %17, %cst_11 {dimension_numbers = #tpu.dot_dimension_numbers<[1], [0], [0], [1], [0, 0, 1, 1], [], []>} : vector<16x128xbf16>, vector<128x128xbf16>, vector<16x128xf32> -> vector<16x128xf32>
    %19 = arith.addf %15, %18 : vector<16x128xf32>
    %c0_12 = arith.constant 0 : index
    %c0_13 = arith.constant 0 : index
    %c0_14 = arith.constant 0 : index
    %c0_15 = arith.constant 0 : index
    %20 = vector.load %arg4[%c0_12, %c0_13, %c0_14, %c0_15] : memref<1x1x18x128xbf16, #tpu.memory_space<vmem>>, vector<1x1x18x128xbf16>
    %21 = vector.shape_cast %20 : vector<1x1x18x128xbf16> to vector<18x128xbf16>
    %cst_16 = arith.constant 0.000000e+00 : bf16
    %22 = vector.broadcast %cst_16 : bf16 to vector<18x128xbf16>
    %23 = arith.cmpf oge, %21, %22 : vector<18x128xbf16>
    %cst_17 = arith.constant 2.001950e-01 : bf16
    %24 = vector.broadcast %cst_17 : bf16 to vector<18x128xbf16>
    %25 = arith.mulf %24, %21 : vector<18x128xbf16>
    %26 = arith.select %23, %21, %25 : vector<18x128xi1>, vector<18x128xbf16>
    %27 = vector.extract_strided_slice %26 {offsets = [0, 0], sizes = [16, 128], strides = [1, 1]} : vector<18x128xbf16> to vector<16x128xbf16>
    %c384 = arith.constant 384 : index
    %c0_18 = arith.constant 0 : index
    %28 = vector.load %arg6[%c384, %c0_18] : memref<1152x128xbf16, #tpu.memory_space<vmem>>, vector<128x128xbf16>
    %cst_19 = arith.constant dense<0.000000e+00> : vector<16x128xf32>
    %29 = tpu.matmul %27, %28, %cst_19 {dimension_numbers = #tpu.dot_dimension_numbers<[1], [0], [0], [1], [0, 0, 1, 1], [], []>} : vector<16x128xbf16>, vector<128x128xbf16>, vector<16x128xf32> -> vector<16x128xf32>
    %30 = arith.addf %19, %29 : vector<16x128xf32>
    %31 = vector.extract_strided_slice %26 {offsets = [1, 0], sizes = [16, 128], strides = [1, 1]} : vector<18x128xbf16> to vector<16x128xbf16>
    %c512 = arith.constant 512 : index
    %c0_20 = arith.constant 0 : index
    %32 = vector.load %arg6[%c512, %c0_20] : memref<1152x128xbf16, #tpu.memory_space<vmem>>, vector<128x128xbf16>
    %cst_21 = arith.constant dense<0.000000e+00> : vector<16x128xf32>
    %33 = tpu.matmul %31, %32, %cst_21 {dimension_numbers = #tpu.dot_dimension_numbers<[1], [0], [0], [1], [0, 0, 1, 1], [], []>} : vector<16x128xbf16>, vector<128x128xbf16>, vector<16x128xf32> -> vector<16x128xf32>
    %34 = arith.addf %30, %33 : vector<16x128xf32>
    %35 = vector.extract_strided_slice %26 {offsets = [2, 0], sizes = [16, 128], strides = [1, 1]} : vector<18x128xbf16> to vector<16x128xbf16>
    %c640 = arith.constant 640 : index
    %c0_22 = arith.constant 0 : index
    %36 = vector.load %arg6[%c640, %c0_22] : memref<1152x128xbf16, #tpu.memory_space<vmem>>, vector<128x128xbf16>
    %cst_23 = arith.constant dense<0.000000e+00> : vector<16x128xf32>
    %37 = tpu.matmul %35, %36, %cst_23 {dimension_numbers = #tpu.dot_dimension_numbers<[1], [0], [0], [1], [0, 0, 1, 1], [], []>} : vector<16x128xbf16>, vector<128x128xbf16>, vector<16x128xf32> -> vector<16x128xf32>
    %38 = arith.addf %34, %37 : vector<16x128xf32>
    %c0_24 = arith.constant 0 : index
    %c0_25 = arith.constant 0 : index
    %c0_26 = arith.constant 0 : index
    %c0_27 = arith.constant 0 : index
    %39 = vector.load %arg5[%c0_24, %c0_25, %c0_26, %c0_27] : memref<1x1x18x128xbf16, #tpu.memory_space<vmem>>, vector<1x1x18x128xbf16>
    %40 = vector.shape_cast %39 : vector<1x1x18x128xbf16> to vector<18x128xbf16>
    %cst_28 = arith.constant 0.000000e+00 : bf16
    %41 = vector.broadcast %cst_28 : bf16 to vector<18x128xbf16>
    %42 = arith.cmpf oge, %40, %41 : vector<18x128xbf16>
    %cst_29 = arith.constant 2.001950e-01 : bf16
    %43 = vector.broadcast %cst_29 : bf16 to vector<18x128xbf16>
    %44 = arith.mulf %43, %40 : vector<18x128xbf16>
    %45 = arith.select %42, %40, %44 : vector<18x128xi1>, vector<18x128xbf16>
    %46 = vector.extract_strided_slice %45 {offsets = [0, 0], sizes = [16, 128], strides = [1, 1]} : vector<18x128xbf16> to vector<16x128xbf16>
    %c768 = arith.constant 768 : index
    %c0_30 = arith.constant 0 : index
    %47 = vector.load %arg6[%c768, %c0_30] : memref<1152x128xbf16, #tpu.memory_space<vmem>>, vector<128x128xbf16>
    %cst_31 = arith.constant dense<0.000000e+00> : vector<16x128xf32>
    %48 = tpu.matmul %46, %47, %cst_31 {dimension_numbers = #tpu.dot_dimension_numbers<[1], [0], [0], [1], [0, 0, 1, 1], [], []>} : vector<16x128xbf16>, vector<128x128xbf16>, vector<16x128xf32> -> vector<16x128xf32>
    %49 = arith.addf %38, %48 : vector<16x128xf32>
    %50 = vector.extract_strided_slice %45 {offsets = [1, 0], sizes = [16, 128], strides = [1, 1]} : vector<18x128xbf16> to vector<16x128xbf16>
    %c896 = arith.constant 896 : index
    %c0_32 = arith.constant 0 : index
    %51 = vector.load %arg6[%c896, %c0_32] : memref<1152x128xbf16, #tpu.memory_space<vmem>>, vector<128x128xbf16>
    %cst_33 = arith.constant dense<0.000000e+00> : vector<16x128xf32>
    %52 = tpu.matmul %50, %51, %cst_33 {dimension_numbers = #tpu.dot_dimension_numbers<[1], [0], [0], [1], [0, 0, 1, 1], [], []>} : vector<16x128xbf16>, vector<128x128xbf16>, vector<16x128xf32> -> vector<16x128xf32>
    %53 = arith.addf %49, %52 : vector<16x128xf32>
    %54 = vector.extract_strided_slice %45 {offsets = [2, 0], sizes = [16, 128], strides = [1, 1]} : vector<18x128xbf16> to vector<16x128xbf16>
    %c1024 = arith.constant 1024 : index
    %c0_34 = arith.constant 0 : index
    %55 = vector.load %arg6[%c1024, %c0_34] : memref<1152x128xbf16, #tpu.memory_space<vmem>>, vector<128x128xbf16>
    %cst_35 = arith.constant dense<0.000000e+00> : vector<16x128xf32>
    %56 = tpu.matmul %54, %55, %cst_35 {dimension_numbers = #tpu.dot_dimension_numbers<[1], [0], [0], [1], [0, 0, 1, 1], [], []>} : vector<16x128xbf16>, vector<128x128xbf16>, vector<16x128xf32> -> vector<16x128xf32>
    %57 = arith.addf %53, %56 : vector<16x128xf32>
    %c0_36 = arith.constant 0 : index
    %c0_37 = arith.constant 0 : index
    %58 = vector.load %arg7[%c0_36, %c0_37] : memref<1x128xf32, #tpu.memory_space<vmem>>, vector<1x128xf32>
    %59 = vector.broadcast %58 : vector<1x128xf32> to vector<16x128xf32>
    %60 = arith.addf %57, %59 : vector<16x128xf32>
    %61 = arith.truncf %60 : vector<16x128xf32> to vector<16x128xbf16>
    %c0_38 = arith.constant 0 : index
    %c0_39 = arith.constant 0 : index
    %c0_40 = arith.constant 0 : index
    %c0_41 = arith.constant 0 : index
    %62 = vector.load %arg8[%c0_38, %c0_39, %c0_40, %c0_41] : memref<1x1x16x128xbf16, #tpu.memory_space<vmem>>, vector<1x1x16x128xbf16>
    %63 = vector.shape_cast %62 : vector<1x1x16x128xbf16> to vector<16x128xbf16>
    %64 = vector.shape_cast %61 : vector<16x128xbf16> to vector<1x1x16x128xbf16>
    tpu.vector_store %arg8[%c0_38, %c0_39, %c0_40, %c0_41], %64 {strides = array<i32>} : memref<1x1x16x128xbf16, #tpu.memory_space<vmem>>, vector<1x1x16x128xbf16>,
    return
  }
  func.func @transform_0(%arg0: i32, %arg1: i32, %arg2: i32) -> (i32, i32, i32, i32) {
    %c0_i32 = arith.constant 0 : i32
    %0 = arith.addi %arg1, %c0_i32 : i32
    %c0_i32_0 = arith.constant 0 : i32
    %c0_i32_1 = arith.constant 0 : i32
    %c0_i32_2 = arith.constant 0 : i32
    return %arg0, %0, %c0_i32_0, %c0_i32_1 : i32, i32, i32, i32
  }
  func.func @transform_1(%arg0: i32, %arg1: i32, %arg2: i32) -> (i32, i32, i32, i32) {
    %c1_i32 = arith.constant 1 : i32
    %0 = arith.addi %arg1, %c1_i32 : i32
    %c0_i32 = arith.constant 0 : i32
    %c0_i32_0 = arith.constant 0 : i32
    %c0_i32_1 = arith.constant 0 : i32
    return %arg0, %0, %c0_i32, %c0_i32_0 : i32, i32, i32, i32
  }
  func.func @transform_2(%arg0: i32, %arg1: i32, %arg2: i32) -> (i32, i32, i32, i32) {
    %c2_i32 = arith.constant 2 : i32
    %0 = arith.addi %arg1, %c2_i32 : i32
    %c0_i32 = arith.constant 0 : i32
    %c0_i32_0 = arith.constant 0 : i32
    %c0_i32_1 = arith.constant 0 : i32
    return %arg0, %0, %c0_i32, %c0_i32_0 : i32, i32, i32, i32
  }
  func.func @transform_3(%arg0: i32, %arg1: i32, %arg2: i32) -> (i32, i32) {
    %c0_i32 = arith.constant 0 : i32
    %c0_i32_0 = arith.constant 0 : i32
    return %c0_i32, %arg2 : i32, i32
  }
  func.func @transform_4(%arg0: i32, %arg1: i32, %arg2: i32) -> (i32, i32) {
    %c0_i32 = arith.constant 0 : i32
    %c0_i32_0 = arith.constant 0 : i32
    return %c0_i32, %arg2 : i32, i32
  }
  func.func @transform_5(%arg0: i32, %arg1: i32, %arg2: i32) -> (i32, i32, i32, i32) {
    %c0_i32 = arith.constant 0 : i32
    %c0_i32_0 = arith.constant 0 : i32
    return %arg0, %arg1, %c0_i32, %arg2 : i32, i32, i32, i32
  }
}

module attributes {stable_mosaic.version = 11 : i64} {
  func.func @_conv_row_kernel(%arg0: i32, %arg1: i32, %arg2: i32, %arg3: memref<1x1x10x128xbf16, #tpu.memory_space<vmem>>, %arg4: memref<1x1x10x128xbf16, #tpu.memory_space<vmem>>, %arg5: memref<1x1x10x128xbf16, #tpu.memory_space<vmem>>, %arg6: memref<1152x128xbf16, #tpu.memory_space<vmem>>, %arg7: memref<1x128xf32, #tpu.memory_space<vmem>>, %arg8: memref<1x1x8x128xbf16, #tpu.memory_space<vmem>>, %arg9: memref<1x1x8x128xf32, #tpu.memory_space<vmem>>) attributes {dimension_semantics = [#tpu.dimension_semantics<parallel>, #tpu.dimension_semantics<parallel>, #tpu.dimension_semantics<arbitrary>], iteration_bounds = array<i64: 2, 8, 1>, scalar_prefetch = 0 : i64, scratch_operands = 0 : i64, tpu.core_type = #tpu.core_type<tc>, window_params = [{transform_indices = @transform_0, window_bounds = array<i64: 1, 1, 10, 128>}, {transform_indices = @transform_1, window_bounds = array<i64: 1, 1, 10, 128>}, {transform_indices = @transform_2, window_bounds = array<i64: 1, 1, 10, 128>}, {transform_indices = @transform_3, window_bounds = array<i64: 1152, 128>}, {transform_indices = @transform_4, window_bounds = array<i64: 1, 128>}, {transform_indices = @transform_5, window_bounds = array<i64: 1, 1, 8, 128>}, {transform_indices = @transform_6, window_bounds = array<i64: 1, 1, 8, 128>}]} {
    %cst = arith.constant 0.000000e+00 : f32
    %0 = vector.broadcast %cst : f32 to vector<8x128xf32>
    %c0 = arith.constant 0 : index
    %c0_0 = arith.constant 0 : index
    %c0_1 = arith.constant 0 : index
    %c0_2 = arith.constant 0 : index
    %1 = vector.load %arg3[%c0, %c0_0, %c0_1, %c0_2] : memref<1x1x10x128xbf16, #tpu.memory_space<vmem>>, vector<1x1x10x128xbf16>
    %2 = vector.shape_cast %1 : vector<1x1x10x128xbf16> to vector<10x128xbf16>
    %cst_3 = arith.constant 0.000000e+00 : bf16
    %3 = vector.broadcast %cst_3 : bf16 to vector<10x128xbf16>
    %4 = arith.cmpf oge, %2, %3 : vector<10x128xbf16>
    %cst_4 = arith.constant 2.001950e-01 : bf16
    %5 = vector.broadcast %cst_4 : bf16 to vector<10x128xbf16>
    %6 = arith.mulf %5, %2 : vector<10x128xbf16>
    %7 = arith.select %4, %2, %6 : vector<10x128xi1>, vector<10x128xbf16>
    %8 = vector.extract_strided_slice %7 {offsets = [0, 0], sizes = [8, 128], strides = [1, 1]} : vector<10x128xbf16> to vector<8x128xbf16>
    %c0_5 = arith.constant 0 : index
    %c0_6 = arith.constant 0 : index
    %9 = vector.load %arg6[%c0_5, %c0_6] : memref<1152x128xbf16, #tpu.memory_space<vmem>>, vector<128x128xbf16>
    %cst_7 = arith.constant dense<0.000000e+00> : vector<8x128xf32>
    %10 = tpu.matmul %8, %9, %cst_7 {dimension_numbers = #tpu.dot_dimension_numbers<[1], [0], [0], [1], [0, 0, 1, 1], [], []>} : vector<8x128xbf16>, vector<128x128xbf16>, vector<8x128xf32> -> vector<8x128xf32>
    %11 = arith.addf %0, %10 : vector<8x128xf32>
    %12 = vector.extract_strided_slice %7 {offsets = [1, 0], sizes = [8, 128], strides = [1, 1]} : vector<10x128xbf16> to vector<8x128xbf16>
    %c128 = arith.constant 128 : index
    %c0_8 = arith.constant 0 : index
    %13 = vector.load %arg6[%c128, %c0_8] : memref<1152x128xbf16, #tpu.memory_space<vmem>>, vector<128x128xbf16>
    %cst_9 = arith.constant dense<0.000000e+00> : vector<8x128xf32>
    %14 = tpu.matmul %12, %13, %cst_9 {dimension_numbers = #tpu.dot_dimension_numbers<[1], [0], [0], [1], [0, 0, 1, 1], [], []>} : vector<8x128xbf16>, vector<128x128xbf16>, vector<8x128xf32> -> vector<8x128xf32>
    %15 = arith.addf %11, %14 : vector<8x128xf32>
    %16 = vector.extract_strided_slice %7 {offsets = [2, 0], sizes = [8, 128], strides = [1, 1]} : vector<10x128xbf16> to vector<8x128xbf16>
    %c256 = arith.constant 256 : index
    %c0_10 = arith.constant 0 : index
    %17 = vector.load %arg6[%c256, %c0_10] : memref<1152x128xbf16, #tpu.memory_space<vmem>>, vector<128x128xbf16>
    %cst_11 = arith.constant dense<0.000000e+00> : vector<8x128xf32>
    %18 = tpu.matmul %16, %17, %cst_11 {dimension_numbers = #tpu.dot_dimension_numbers<[1], [0], [0], [1], [0, 0, 1, 1], [], []>} : vector<8x128xbf16>, vector<128x128xbf16>, vector<8x128xf32> -> vector<8x128xf32>
    %19 = arith.addf %15, %18 : vector<8x128xf32>
    %c0_12 = arith.constant 0 : index
    %c0_13 = arith.constant 0 : index
    %c0_14 = arith.constant 0 : index
    %c0_15 = arith.constant 0 : index
    %20 = vector.load %arg4[%c0_12, %c0_13, %c0_14, %c0_15] : memref<1x1x10x128xbf16, #tpu.memory_space<vmem>>, vector<1x1x10x128xbf16>
    %21 = vector.shape_cast %20 : vector<1x1x10x128xbf16> to vector<10x128xbf16>
    %cst_16 = arith.constant 0.000000e+00 : bf16
    %22 = vector.broadcast %cst_16 : bf16 to vector<10x128xbf16>
    %23 = arith.cmpf oge, %21, %22 : vector<10x128xbf16>
    %cst_17 = arith.constant 2.001950e-01 : bf16
    %24 = vector.broadcast %cst_17 : bf16 to vector<10x128xbf16>
    %25 = arith.mulf %24, %21 : vector<10x128xbf16>
    %26 = arith.select %23, %21, %25 : vector<10x128xi1>, vector<10x128xbf16>
    %27 = vector.extract_strided_slice %26 {offsets = [0, 0], sizes = [8, 128], strides = [1, 1]} : vector<10x128xbf16> to vector<8x128xbf16>
    %c384 = arith.constant 384 : index
    %c0_18 = arith.constant 0 : index
    %28 = vector.load %arg6[%c384, %c0_18] : memref<1152x128xbf16, #tpu.memory_space<vmem>>, vector<128x128xbf16>
    %cst_19 = arith.constant dense<0.000000e+00> : vector<8x128xf32>
    %29 = tpu.matmul %27, %28, %cst_19 {dimension_numbers = #tpu.dot_dimension_numbers<[1], [0], [0], [1], [0, 0, 1, 1], [], []>} : vector<8x128xbf16>, vector<128x128xbf16>, vector<8x128xf32> -> vector<8x128xf32>
    %30 = arith.addf %19, %29 : vector<8x128xf32>
    %31 = vector.extract_strided_slice %26 {offsets = [1, 0], sizes = [8, 128], strides = [1, 1]} : vector<10x128xbf16> to vector<8x128xbf16>
    %c512 = arith.constant 512 : index
    %c0_20 = arith.constant 0 : index
    %32 = vector.load %arg6[%c512, %c0_20] : memref<1152x128xbf16, #tpu.memory_space<vmem>>, vector<128x128xbf16>
    %cst_21 = arith.constant dense<0.000000e+00> : vector<8x128xf32>
    %33 = tpu.matmul %31, %32, %cst_21 {dimension_numbers = #tpu.dot_dimension_numbers<[1], [0], [0], [1], [0, 0, 1, 1], [], []>} : vector<8x128xbf16>, vector<128x128xbf16>, vector<8x128xf32> -> vector<8x128xf32>
    %34 = arith.addf %30, %33 : vector<8x128xf32>
    %35 = vector.extract_strided_slice %26 {offsets = [2, 0], sizes = [8, 128], strides = [1, 1]} : vector<10x128xbf16> to vector<8x128xbf16>
    %c640 = arith.constant 640 : index
    %c0_22 = arith.constant 0 : index
    %36 = vector.load %arg6[%c640, %c0_22] : memref<1152x128xbf16, #tpu.memory_space<vmem>>, vector<128x128xbf16>
    %cst_23 = arith.constant dense<0.000000e+00> : vector<8x128xf32>
    %37 = tpu.matmul %35, %36, %cst_23 {dimension_numbers = #tpu.dot_dimension_numbers<[1], [0], [0], [1], [0, 0, 1, 1], [], []>} : vector<8x128xbf16>, vector<128x128xbf16>, vector<8x128xf32> -> vector<8x128xf32>
    %38 = arith.addf %34, %37 : vector<8x128xf32>
    %c0_24 = arith.constant 0 : index
    %c0_25 = arith.constant 0 : index
    %c0_26 = arith.constant 0 : index
    %c0_27 = arith.constant 0 : index
    %39 = vector.load %arg5[%c0_24, %c0_25, %c0_26, %c0_27] : memref<1x1x10x128xbf16, #tpu.memory_space<vmem>>, vector<1x1x10x128xbf16>
    %40 = vector.shape_cast %39 : vector<1x1x10x128xbf16> to vector<10x128xbf16>
    %cst_28 = arith.constant 0.000000e+00 : bf16
    %41 = vector.broadcast %cst_28 : bf16 to vector<10x128xbf16>
    %42 = arith.cmpf oge, %40, %41 : vector<10x128xbf16>
    %cst_29 = arith.constant 2.001950e-01 : bf16
    %43 = vector.broadcast %cst_29 : bf16 to vector<10x128xbf16>
    %44 = arith.mulf %43, %40 : vector<10x128xbf16>
    %45 = arith.select %42, %40, %44 : vector<10x128xi1>, vector<10x128xbf16>
    %46 = vector.extract_strided_slice %45 {offsets = [0, 0], sizes = [8, 128], strides = [1, 1]} : vector<10x128xbf16> to vector<8x128xbf16>
    %c768 = arith.constant 768 : index
    %c0_30 = arith.constant 0 : index
    %47 = vector.load %arg6[%c768, %c0_30] : memref<1152x128xbf16, #tpu.memory_space<vmem>>, vector<128x128xbf16>
    %cst_31 = arith.constant dense<0.000000e+00> : vector<8x128xf32>
    %48 = tpu.matmul %46, %47, %cst_31 {dimension_numbers = #tpu.dot_dimension_numbers<[1], [0], [0], [1], [0, 0, 1, 1], [], []>} : vector<8x128xbf16>, vector<128x128xbf16>, vector<8x128xf32> -> vector<8x128xf32>
    %49 = arith.addf %38, %48 : vector<8x128xf32>
    %50 = vector.extract_strided_slice %45 {offsets = [1, 0], sizes = [8, 128], strides = [1, 1]} : vector<10x128xbf16> to vector<8x128xbf16>
    %c896 = arith.constant 896 : index
    %c0_32 = arith.constant 0 : index
    %51 = vector.load %arg6[%c896, %c0_32] : memref<1152x128xbf16, #tpu.memory_space<vmem>>, vector<128x128xbf16>
    %cst_33 = arith.constant dense<0.000000e+00> : vector<8x128xf32>
    %52 = tpu.matmul %50, %51, %cst_33 {dimension_numbers = #tpu.dot_dimension_numbers<[1], [0], [0], [1], [0, 0, 1, 1], [], []>} : vector<8x128xbf16>, vector<128x128xbf16>, vector<8x128xf32> -> vector<8x128xf32>
    %53 = arith.addf %49, %52 : vector<8x128xf32>
    %54 = vector.extract_strided_slice %45 {offsets = [2, 0], sizes = [8, 128], strides = [1, 1]} : vector<10x128xbf16> to vector<8x128xbf16>
    %c1024 = arith.constant 1024 : index
    %c0_34 = arith.constant 0 : index
    %55 = vector.load %arg6[%c1024, %c0_34] : memref<1152x128xbf16, #tpu.memory_space<vmem>>, vector<128x128xbf16>
    %cst_35 = arith.constant dense<0.000000e+00> : vector<8x128xf32>
    %56 = tpu.matmul %54, %55, %cst_35 {dimension_numbers = #tpu.dot_dimension_numbers<[1], [0], [0], [1], [0, 0, 1, 1], [], []>} : vector<8x128xbf16>, vector<128x128xbf16>, vector<8x128xf32> -> vector<8x128xf32>
    %57 = arith.addf %53, %56 : vector<8x128xf32>
    %c0_36 = arith.constant 0 : index
    %c0_37 = arith.constant 0 : index
    %58 = vector.load %arg7[%c0_36, %c0_37] : memref<1x128xf32, #tpu.memory_space<vmem>>, vector<1x128xf32>
    %59 = vector.broadcast %58 : vector<1x128xf32> to vector<8x128xf32>
    %60 = arith.addf %57, %59 : vector<8x128xf32>
    %c0_38 = arith.constant 0 : index
    %c0_39 = arith.constant 0 : index
    %c0_40 = arith.constant 0 : index
    %c0_41 = arith.constant 0 : index
    %61 = vector.load %arg8[%c0_38, %c0_39, %c0_40, %c0_41] : memref<1x1x8x128xbf16, #tpu.memory_space<vmem>>, vector<1x1x8x128xbf16>
    %62 = vector.shape_cast %61 : vector<1x1x8x128xbf16> to vector<8x128xbf16>
    %63 = arith.extf %62 : vector<8x128xbf16> to vector<8x128xf32>
    %64 = arith.addf %60, %63 : vector<8x128xf32>
    %cst_42 = arith.constant 0.707106769 : f32
    %65 = vector.broadcast %cst_42 : f32 to vector<8x128xf32>
    %66 = arith.mulf %64, %65 : vector<8x128xf32>
    %c0_43 = arith.constant 0 : index
    %c0_44 = arith.constant 0 : index
    %c0_45 = arith.constant 0 : index
    %c0_46 = arith.constant 0 : index
    %67 = vector.load %arg9[%c0_43, %c0_44, %c0_45, %c0_46] : memref<1x1x8x128xf32, #tpu.memory_space<vmem>>, vector<1x1x8x128xf32>
    %68 = vector.shape_cast %67 : vector<1x1x8x128xf32> to vector<8x128xf32>
    %69 = vector.shape_cast %66 : vector<8x128xf32> to vector<1x1x8x128xf32>
    tpu.vector_store %arg9[%c0_43, %c0_44, %c0_45, %c0_46], %69 {strides = array<i32>} : memref<1x1x8x128xf32, #tpu.memory_space<vmem>>, vector<1x1x8x128xf32>,
    return
  }
  func.func @transform_0(%arg0: i32, %arg1: i32, %arg2: i32) -> (i32, i32, i32, i32) {
    %c0_i32 = arith.constant 0 : i32
    %0 = arith.addi %arg1, %c0_i32 : i32
    %c0_i32_0 = arith.constant 0 : i32
    %c0_i32_1 = arith.constant 0 : i32
    %c0_i32_2 = arith.constant 0 : i32
    return %arg0, %0, %c0_i32_0, %c0_i32_1 : i32, i32, i32, i32
  }
  func.func @transform_1(%arg0: i32, %arg1: i32, %arg2: i32) -> (i32, i32, i32, i32) {
    %c1_i32 = arith.constant 1 : i32
    %0 = arith.addi %arg1, %c1_i32 : i32
    %c0_i32 = arith.constant 0 : i32
    %c0_i32_0 = arith.constant 0 : i32
    %c0_i32_1 = arith.constant 0 : i32
    return %arg0, %0, %c0_i32, %c0_i32_0 : i32, i32, i32, i32
  }
  func.func @transform_2(%arg0: i32, %arg1: i32, %arg2: i32) -> (i32, i32, i32, i32) {
    %c2_i32 = arith.constant 2 : i32
    %0 = arith.addi %arg1, %c2_i32 : i32
    %c0_i32 = arith.constant 0 : i32
    %c0_i32_0 = arith.constant 0 : i32
    %c0_i32_1 = arith.constant 0 : i32
    return %arg0, %0, %c0_i32, %c0_i32_0 : i32, i32, i32, i32
  }
  func.func @transform_3(%arg0: i32, %arg1: i32, %arg2: i32) -> (i32, i32) {
    %c0_i32 = arith.constant 0 : i32
    %c0_i32_0 = arith.constant 0 : i32
    return %c0_i32, %arg2 : i32, i32
  }
  func.func @transform_4(%arg0: i32, %arg1: i32, %arg2: i32) -> (i32, i32) {
    %c0_i32 = arith.constant 0 : i32
    %c0_i32_0 = arith.constant 0 : i32
    return %c0_i32, %arg2 : i32, i32
  }
  func.func @transform_5(%arg0: i32, %arg1: i32, %arg2: i32) -> (i32, i32, i32, i32) {
    %c0_i32 = arith.constant 0 : i32
    %c0_i32_0 = arith.constant 0 : i32
    return %arg0, %arg1, %c0_i32, %arg2 : i32, i32, i32, i32
  }
  func.func @transform_6(%arg0: i32, %arg1: i32, %arg2: i32) -> (i32, i32, i32, i32) {
    %c0_i32 = arith.constant 0 : i32
    %c0_i32_0 = arith.constant 0 : i32
    return %arg0, %arg1, %c0_i32, %arg2 : i32, i32, i32, i32
  }
}

</mosaic_0001>

<bundles_post_ra>
// kernel: _lambda_.5
= control target key start
LH: loop header
LB: loop body
LE: loop exit
PB: predicated region body
PF: predicated region fallthrough
CT: control target
= control target key end

     0   :  { %s381_s0 = inlined_call_operand.vmem [shape: bf16[16,2,8,256], index: 0, kind: input, shape index: {}]   ;;  %s382_s1 = inlined_call_operand.vmem [shape: bf16[16,8,128], index: 1, kind: output, shape index: {}]  }
   0x1   :  { %v8_v0 = vld [vmem:[%s381_s0] sm:$0xff]  ;;  %v9_v1 = vld [vmem:[%s381_s0 + $0x8] sm:$0xff]  ;;  %v10_v2 = vld [vmem:[%s381_s0 + $0x10] sm:$0xff] }
   0x2   :  { %v11_v3 = vld [vmem:[%s381_s0 + $0x18] sm:$0xff]  ;;  %v40_v4 = vunpack.c.l.bf16 %v8_v0  ;;  %v41_v5 = vunpack.c.h.bf16 %v8_v0  ;;  %v42_v6 = vunpack.c.l.bf16 %v9_v1  ;;  %v43_v7 = vunpack.c.h.bf16 %v9_v1  ;;  %v12_v8 = vld [vmem:[%s381_s0 + $0x20] sm:$0xff]  ;;  %v13_v9 = vld [vmem:[%s381_s0 + $0x28] sm:$0xff] }
   0x3   :  { %v44_v10 = vunpack.c.l.bf16 %v10_v2  ;;  %v45_v11 = vunpack.c.h.bf16 %v10_v2  ;;  %v46_v12 = vunpack.c.l.bf16 %v11_v3  ;;  %v47_v13 = vunpack.c.h.bf16 %v11_v3  ;;  %v14_v14 = vld [vmem:[%s381_s0 + $0x30] sm:$0xff]  ;;  %v15_v15 = vld [vmem:[%s381_s0 + $0x38] sm:$0xff]  ;;  %v16_v24 = vld [vmem:[%s381_s0 + $0x40] sm:$0xff] }
   0x4   :  { %v104_v16 = vadd.f32 %v42_v6, %v40_v4  ;;  %v105_v17 = vadd.f32 %v43_v7, %v41_v5  ;;  %v48_v18 = vunpack.c.l.bf16 %v12_v8  ;;  %v49_v19 = vunpack.c.h.bf16 %v12_v8  ;;  %v17_v29 = vld [vmem:[%s381_s0 + $0x48] sm:$0xff]  ;;  %v18_v34 = vld [vmem:[%s381_s0 + $0x50] sm:$0xff]  ;;  %v19_v35 = vld [vmem:[%s381_s0 + $0x58] sm:$0xff] }
   0x5   :  { %v106_v20 = vadd.f32 %v46_v12, %v44_v10  ;;  %v107_v21 = vadd.f32 %v47_v13, %v45_v11  ;;  %v50_v22 = vunpack.c.l.bf16 %v13_v9  ;;  %v51_v23 = vunpack.c.h.bf16 %v13_v9  ;;  %v20_v44 = vld [vmem:[%s381_s0 + $0x60] sm:$0xff]  ;;  %v21_v49 = vld [vmem:[%s381_s0 + $0x68] sm:$0xff]  ;;  %v22_v54 = vld [vmem:[%s381_s0 + $0x70] sm:$0xff] }
   0x6   :  { %v136_v25 = vadd.f32 %v105_v17, %v104_v16  ;;  %v52_v26 = vunpack.c.l.bf16 %v14_v14  ;;  %v53_v27 = vunpack.c.h.bf16 %v14_v14  ;;  %v54_v28 = vunpack.c.l.bf16 %v15_v15  ;;  %v23_v58 = vld [vmem:[%s381_s0 + $0x78] sm:$0xff]  ;;  %v24_v0 = vld [vmem:[%s381_s0 + $0x80] sm:$0xff]  ;;  %v25_v9 = vld [vmem:[%s381_s0 + $0x88] sm:$0xff] }
   0x7   :  { %v137_v30 = vadd.f32 %v107_v21, %v106_v20  ;;  %v55_v31 = vunpack.c.h.bf16 %v15_v15  ;;  %v108_v32 = vadd.f32 %v50_v22, %v48_v18  ;;  %v109_v33 = vadd.f32 %v51_v23, %v49_v19  ;;  %v26_v10 = vld [vmem:[%s381_s0 + $0x90] sm:$0xff]  ;;  %v27_v14 = vld [vmem:[%s381_s0 + $0x98] sm:$0xff] }
   0x8   :  { %v152_v36 = vmul.f32 0.25, %v136_v25  ;;  %v110_v37 = vadd.f32 %v54_v28, %v52_v26  ;;  %v56_v38 = vunpack.c.l.bf16 %v16_v24  ;;  %v57_v39 = vunpack.c.h.bf16 %v16_v24  ;;  %v28_v24 = vld [vmem:[%s381_s0 + $0xa0] sm:$0xff] }
   0x9   :  { %v153_v40 = vmul.f32 0.25, %v137_v30  ;;  %v111_v41 = vadd.f32 %v55_v31, %v53_v27  ;;  %v138_v42 = vadd.f32 %v109_v33, %v108_v32  ;;  %v58_v43 = vunpack.c.l.bf16 %v17_v29 }
   0xa   :  { %v59_v45 = vunpack.c.h.bf16 %v17_v29  ;;  %v60_v46 = vunpack.c.l.bf16 %v18_v34  ;;  %v61_v47 = vunpack.c.h.bf16 %v18_v34  ;;  %v62_v48 = vunpack.c.l.bf16 %v19_v35  ;;  %v29_v29 = vld [vmem:[%s381_s0 + $0xa8] sm:$0xff]  ;;  %v30_v34 = vld [vmem:[%s381_s0 + $0xb0] sm:$0xff] }
   0xb   :  { %v207_v50 = vpack.c.bf16 %v153_v40, %v152_v36  ;;  %v139_v51 = vadd.f32 %v111_v41, %v110_v37  ;;  %v154_v52 = vmul.f32 0.25, %v138_v42  ;;  %v63_v53 = vunpack.c.h.bf16 %v19_v35  ;;  %v31_v35 = vld [vmem:[%s381_s0 + $0xb8] sm:$0xff] }
   0xc   :  { %v112_v55 = vadd.f32 %v58_v43, %v56_v38  ;;  %v113_v56 = vadd.f32 %v59_v45, %v57_v39  ;;  %v114_v57 = vadd.f32 %v62_v48, %v60_v46  ;;  %v64_v59 = vunpack.c.l.bf16 %v20_v44 }
   0xd   :  { %208 = vst [vmem:[%s382_s1] sm:$0xff] %v207_v50   ;;  %v155_v60 = vmul.f32 0.25, %v139_v51  ;;  %v115_v61 = vadd.f32 %v63_v53, %v61_v47  ;;  %v65_v62 = vunpack.c.h.bf16 %v20_v44  ;;  %v66_v63 = vunpack.c.l.bf16 %v21_v49  ;;  %v32_v44 = vld [vmem:[%s381_s0 + $0xc0] sm:$0xff] }
   0xe   :  { %v140_v1 = vadd.f32 %v113_v56, %v112_v55  ;;  %v67_v2 = vunpack.c.h.bf16 %v21_v49  ;;  %v68_v3 = vunpack.c.l.bf16 %v22_v54  ;;  %v69_v4 = vunpack.c.h.bf16 %v22_v54  ;;  %v33_v49 = vld [vmem:[%s381_s0 + $0xc8] sm:$0xff]  ;;  %v34_v54 = vld [vmem:[%s381_s0 + $0xd0] sm:$0xff]  ;;  %v35_v55 = vld [vmem:[%s381_s0 + $0xd8] sm:$0xff] }
   0xf   :  { %v212_v5 = vpack.c.bf16 %v155_v60, %v154_v52  ;;  %v141_v6 = vadd.f32 %v115_v61, %v114_v57  ;;  %v70_v7 = vunpack.c.l.bf16 %v23_v58  ;;  %v71_v8 = vunpack.c.h.bf16 %v23_v58 }
  0x10   :  { %v156_v11 = vmul.f32 0.25, %v140_v1  ;;  %v116_v12 = vadd.f32 %v66_v63, %v64_v59  ;;  %v117_v13 = vadd.f32 %v67_v2, %v65_v62  ;;  %v72_v15 = vunpack.c.l.bf16 %v24_v0 }
  0x11   :  { %244 = vst [vmem:[%s382_s1 + $0x8] sm:$0xff] %v212_v5   ;;  %v157_v16 = vmul.f32 0.25, %v141_v6  ;;  %v118_v17 = vadd.f32 %v70_v7, %v68_v3  ;;  %v119_v18 = vadd.f32 %v71_v8, %v69_v4  ;;  %v73_v19 = vunpack.c.h.bf16 %v24_v0  ;;  %v36_v0 = vld [vmem:[%s381_s0 + $0xe0] sm:$0xff]  ;;  %v37_v5 = vld [vmem:[%s381_s0 + $0xe8] sm:$0xff] }
  0x12   :  { %v142_v20 = vadd.f32 %v117_v13, %v116_v12  ;;  %v74_v21 = vunpack.c.l.bf16 %v25_v9  ;;  %v75_v22 = vunpack.c.h.bf16 %v25_v9  ;;  %v76_v23 = vunpack.c.l.bf16 %v26_v10 }
  0x13   :  { %v217_v25 = vpack.c.bf16 %v157_v16, %v156_v11  ;;  %v143_v26 = vadd.f32 %v119_v18, %v118_v17  ;;  %v77_v27 = vunpack.c.h.bf16 %v26_v10  ;;  %v78_v28 = vunpack.c.l.bf16 %v27_v14  ;;  %v38_v10 = vld [vmem:[%s381_s0 + $0xf0] sm:$0xff] }
  0x14   :  { %v158_v30 = vmul.f32 0.25, %v142_v20  ;;  %v79_v31 = vunpack.c.h.bf16 %v27_v14  ;;  %v120_v32 = vadd.f32 %v74_v21, %v72_v15  ;;  %v121_v33 = vadd.f32 %v75_v22, %v73_v19  ;;  %v39_v14 = vld [vmem:[%s381_s0 + $0xf8] sm:$0xff] }
  0x15   :  { %245 = vst [vmem:[%s382_s1 + $0x10] sm:$0xff] %v217_v25   ;;  %v159_v36 = vmul.f32 0.25, %v143_v26  ;;  %v122_v37 = vadd.f32 %v78_v28, %v76_v23  ;;  %v80_v38 = vunpack.c.l.bf16 %v28_v24  ;;  %v81_v39 = vunpack.c.h.bf16 %v28_v24 }
  0x16   :  { %v123_v40 = vadd.f32 %v79_v31, %v77_v27  ;;  %v144_v41 = vadd.f32 %v121_v33, %v120_v32  ;;  %v82_v42 = vunpack.c.l.bf16 %v29_v29  ;;  %v83_v43 = vunpack.c.h.bf16 %v29_v29 }
  0x17   :  { %v222_v45 = vpack.c.bf16 %v159_v36, %v158_v30  ;;  %v84_v46 = vunpack.c.l.bf16 %v30_v34  ;;  %v85_v47 = vunpack.c.h.bf16 %v30_v34  ;;  %v86_v48 = vunpack.c.l.bf16 %v31_v35 }
  0x18   :  { %v145_v50 = vadd.f32 %v123_v40, %v122_v37  ;;  %v160_v51 = vmul.f32 0.25, %v144_v41  ;;  %v87_v52 = vunpack.c.h.bf16 %v31_v35  ;;  %v124_v53 = vadd.f32 %v82_v42, %v80_v38 }
  0x19   :  { %246 = vst [vmem:[%s382_s1 + $0x18] sm:$0xff] %v222_v45   ;;  %v125_v56 = vadd.f32 %v83_v43, %v81_v39  ;;  %v126_v57 = vadd.f32 %v86_v48, %v84_v46  ;;  %v88_v58 = vunpack.c.l.bf16 %v32_v44  ;;  %v89_v59 = vunpack.c.h.bf16 %v32_v44 }
  0x1a   :  { %v161_v60 = vmul.f32 0.25, %v145_v50  ;;  %v127_v61 = vadd.f32 %v87_v52, %v85_v47  ;;  %v90_v62 = vunpack.c.l.bf16 %v33_v49  ;;  %v91_v63 = vunpack.c.h.bf16 %v33_v49 }
  0x1b   :  { %v146_v1 = vadd.f32 %v125_v56, %v124_v53  ;;  %v92_v2 = vunpack.c.l.bf16 %v34_v54  ;;  %v93_v3 = vunpack.c.h.bf16 %v34_v54  ;;  %v94_v4 = vunpack.c.l.bf16 %v35_v55 }
  0x1c   :  { %v227_v6 = vpack.c.bf16 %v161_v60, %v160_v51  ;;  %v147_v7 = vadd.f32 %v127_v61, %v126_v57  ;;  %v95_v8 = vunpack.c.h.bf16 %v35_v55  ;;  %v128_v9 = vadd.f32 %v90_v62, %v88_v58 }
  0x1d   :  { %v162_v11 = vmul.f32 0.25, %v146_v1  ;;  %v129_v12 = vadd.f32 %v91_v63, %v89_v59  ;;  %v130_v13 = vadd.f32 %v94_v4, %v92_v2  ;;  %v96_v15 = vunpack.c.l.bf16 %v36_v0 }
  0x1e   :  { %247 = vst [vmem:[%s382_s1 + $0x20] sm:$0xff] %v227_v6   ;;  %v163_v16 = vmul.f32 0.25, %v147_v7  ;;  %v131_v17 = vadd.f32 %v95_v8, %v93_v3  ;;  %v97_v18 = vunpack.c.h.bf16 %v36_v0  ;;  %v98_v19 = vunpack.c.l.bf16 %v37_v5 }
  0x1f   :  { %v148_v20 = vadd.f32 %v129_v12, %v128_v9  ;;  %v99_v21 = vunpack.c.h.bf16 %v37_v5  ;;  %v100_v22 = vunpack.c.l.bf16 %v38_v10  ;;  %v101_v23 = vunpack.c.h.bf16 %v38_v10 }
  0x20   :  { %v232_v24 = vpack.c.bf16 %v163_v16, %v162_v11  ;;  %v149_v25 = vadd.f32 %v131_v17, %v130_v13  ;;  %v102_v26 = vunpack.c.l.bf16 %v39_v14  ;;  %v103_v27 = vunpack.c.h.bf16 %v39_v14 }
  0x21   :  { %v164_v28 = vmul.f32 0.25, %v148_v20  ;;  %v132_v29 = vadd.f32 %v98_v19, %v96_v15  ;;  %v133_v30 = vadd.f32 %v99_v21, %v97_v18 }
  0x22   :  { %248 = vst [vmem:[%s382_s1 + $0x28] sm:$0xff] %v232_v24   ;;  %v165_v31 = vmul.f32 0.25, %v149_v25  ;;  %v134_v32 = vadd.f32 %v102_v26, %v100_v22  ;;  %v135_v33 = vadd.f32 %v103_v27, %v101_v23 }
  0x23   :  { %v150_v34 = vadd.f32 %v133_v30, %v132_v29 }
  0x24   :  { %v237_v35 = vpack.c.bf16 %v165_v31, %v164_v28  ;;  %v151_v36 = vadd.f32 %v135_v33, %v134_v32 }
  0x25   :  { %v166_v37 = vmul.f32 0.25, %v150_v34 }
  0x26   :  { %249 = vst [vmem:[%s382_s1 + $0x30] sm:$0xff] %v237_v35   ;;  %v167_v38 = vmul.f32 0.25, %v151_v36 }
  0x28   :  { %v242_v39 = vpack.c.bf16 %v167_v38, %v166_v37 }
  0x2a   :  { %250 = vst [vmem:[%s382_s1 + $0x38] sm:$0xff] %v242_v39  }

// kernel: _lambda_.6
= control target key start
LH: loop header
LB: loop body
LE: loop exit
PB: predicated region body
PF: predicated region fallthrough
CT: control target
= control target key end

     0   :  { %s653_s12 = smov 0   ;;  %s655_s13 = smov 0   ;;  %s739_s0 = inlined_call_operand.vmem [shape: bf16[2,8,8,128], index: 0, kind: input, shape index: {}]   ;;  %s740_s1 = inlined_call_operand.vmem [shape: bf16[128,128], index: 1, kind: input, shape index: {}]   ;;  %s741_s2 = inlined_call_operand.vmem [shape: f32[1,128], index: 2, kind: input, shape index: {}]   ;;  %s742_s3 = inlined_call_operand.vmem [shape: bf16[2,8,8,128], index: 3, kind: output, shape index: {}]  }
   0x1   :  { %s657_s14 = smov 0   ;;  %s659_s15 = smov 0  }
   0x2   :  { %s661_s16 = smov 0  }
   0x3 LB: > { %s28_s17 = sadd.s32 1, %s621_s14  ;;  %s32_s18 = sadd.s32 1, %s625_s15  ;;  %s629_s16 = sphi %s661_s16, %s13_s16   ;;  %s625_s15 = sphi %s659_s15, %s746_s15   ;;  %s621_s14 = sphi %s657_s14, %s745_s14   ;;  %s617_s13 = sphi %s655_s13, %s744_s13   ;;  %s613_s12 = sphi %s653_s12, %s743_s12  }
   0x4   : > { %p30_p0 = scmp.ge.s32.totalorder %s28_s17, 8  ;;  %p496_p1 = scmp.ge.s32.totalorder %s629_s16, 1 }
   0x5   : > { %p182_p2 = scmp.lt.s32.totalorder %s629_s16, 17 }
   0x6   : > { %s748_s17 = smov (%p30_p0, %s28_s17), 0  ;;  %s750_s18 = smov (!%p30_p0, %s32_s18), %s625_s15 }
   0x7   : > { %p183_p3 = pnand %p496_p1, %p182_p2  ;;  %p34_p4 = scmp.ge.s32.totalorder %s750_s18, 2 }
   0x8   : > { %v583_v0 = vld [vmem:[%s740_s1] sm:$0xff] (!%p183_p3)   ;;  %v631_v1 = vmov (!%p183_p3), 0.0   ;;  %v584_v2 = vld [vmem:[%s740_s1 + $0x8] sm:$0xff] (!%p183_p3)   ;;  %vm632_vm0 = vmmov (!%p183_p3), 0   ;;  %v585_v3 = vld [vmem:[%s740_s1 + $0x10] sm:$0xff] (!%p183_p3)   ;;  %p222_p5 = scmp.lt.s32.totalorder (!%p183_p3), %s617_s13, 1 }
   0x9   : > { %s752_s18 = smov (%p34_p4, %s750_s18), 0  ;;  %186 = sbr.rel (%p183_p3) target bundleno = 259 (0x103), region = 32 }
   0xa   : > { %521 = vmatprep.subr.bf16.mxu0 (!%p183_p3), %v631_v1  ;;  %537 = vmatprep.mubr.msk.bf16.mxu0 (!%p183_p3), %vm632_vm0, %v631_v1  ;;  %v586_v4 = vld [vmem:[%s740_s1 + $0x18] sm:$0xff] (!%p183_p3)   ;;  %p224_p6 = scmp.lt.s32.totalorder (!%p183_p3), %s613_s12, 7  ;;  %v587_v5 = vld [vmem:[%s740_s1 + $0x20] sm:$0xff] (!%p183_p3)   ;;  %v588_v6 = vld [vmem:[%s740_s1 + $0x28] sm:$0xff] (!%p183_p3)  }
   0xb   : > { %522 = vmatpush3.bf16.msra.mxu0 (!%p183_p3), %v583_v0  ;;  %v589_v7 = vld [vmem:[%s740_s1 + $0x30] sm:$0xff] (!%p183_p3)   ;;  %v590_v8 = vld [vmem:[%s740_s1 + $0x38] sm:$0xff] (!%p183_p3)   ;;  %v501_v10 = vld [vmem:[%s741_s2] ss:$0 sm:$0xff] (!%p183_p3) }
   0xc   : > { %523 = vmatprep.subr.bf16.mxu0 (!%p183_p3), %v631_v1 }
   0xf   : > { %524 = vmatpush3.bf16.msra.mxu0 (!%p183_p3), %v584_v2 }
  0x10   : > { %525 = vmatprep.subr.bf16.mxu0 %v631_v1  ;;  %s754_s13 = smov (!%p222_p5, %s617_s13), 1  ;;  %s756_s12 = smov (!%p224_p6, %s613_s12), 7 }
  0x11   : > { %s497_s4 = sshll.u32 %s754_s13, 3 }
  0x12   : > { %s227_s5 = sadd.s32 %s497_s4, %s756_s12 }
  0x13   : > { %526 = vmatpush3.bf16.msra.mxu0 %v585_v3  ;;  %s498_s8 = sshll.u32 %s227_s5, 2 }
  0x14   : > { %527 = vmatprep.subr.bf16.mxu0 %v631_v1  ;;  %s229_s20 = scalar_lea.vmem %s739_s0, %s498_s8  ;;  %s247_s23 = scalar_lea.vmem %s742_s3, %s498_s8 }
  0x15   : > { %v249_v9 = vld [vmem:[%s229_s20] sm:$0xf] }
  0x17   : > { %528 = vmatpush3.bf16.msra.mxu0 %v586_v4 }
  0x18   : > { %529 = vmatprep.subr.bf16.mxu0 %v631_v1 }
  0x1b   : > { %530 = vmatpush3.bf16.msra.mxu0 %v587_v5 }
  0x1c   : > { %531 = vmatprep.subr.bf16.mxu0 %v631_v1 }
  0x1f   : > { %532 = vmatpush3.bf16.msra.mxu0 %v588_v6 }
  0x20   : > { %533 = vmatprep.subr.bf16.mxu0 %v631_v1 }
  0x23   : > { %534 = vmatpush3.bf16.msra.mxu0 %v589_v7 }
  0x24   : > { %535 = vmatprep.subr.bf16.mxu0 %v631_v1 }
  0x27   : > { %536 = vmatpush3.bf16.msra.mxu0 %v590_v8 }
  0x2a   : > { %538 = vmatmul.mubr.bf16.vlgmr.msra.gmra.mrb[0].mxu0 %v249_v9 }
  0xfd   : > { %v355_v11 = vpop.f32.mrb[0].mxu0 }
  0xfe   : > { %v356_v12 = vadd.f32 %v501_v10, %v355_v11  ;;  %v539_v13 = vpop.f32.mrb[1].mxu0 }
  0xff   : > { %v358_v14 = vpop.f32.mrb[2].mxu0 }
 0x100   : > { %v361_v15 = vpack.c.bf16 %v356_v12, %v356_v12  ;;  %v540_v16 = vpop.f32.mrb[3].mxu0 }
 0x102   : > { %362 = vst [vmem:[%s247_s23] sm:$0xf] %v361_v15 }
 0x103 PF: > { %s13_s16 = sadd.s32 1, %s629_s16   ;;  %s743_s12 = smov %s621_s14 }
 0x104   : > { %p10_p7 = scmp.ge.s32.totalorder %s13_s16, 18   ;;  %s744_s13 = smov %s625_s15 }
 0x105   : > { %s745_s14 = smov %s748_s17  ;;  %s746_s15 = smov %s752_s18 }
 0x106   :  { %12 = sbr.rel (!%p10_p7) target bundleno = 3 (0x3), region = 68 }

// kernel: _lambda_.7
= control target key start
LH: loop header
LB: loop body
LE: loop exit
PB: predicated region body
PF: predicated region fallthrough
CT: control target
= control target key end

     0   :  { %s2217_s18 = smov 0   ;;  %s2219_s19 = smov 0   ;;  %s2646_s0 = inlined_call_operand.vmem [shape: bf16[2,18,18,128], index: 0, kind: input, shape index: {}, may-alias: {0,1,2}]   ;;  %s2647_s1 = inlined_call_operand.vmem [shape: bf16[2,18,18,128], index: 1, kind: input, shape index: {}, may-alias: {0,1,2}]   ;;  %s2648_s2 = inlined_call_operand.vmem [shape: bf16[2,18,18,128], index: 2, kind: input, shape index: {}, may-alias: {0,1,2}]   ;;  %s2649_s3 = inlined_call_operand.vmem [shape: bf16[1152,128], index: 3, kind: input, shape index: {}]   ;;  %s2650_s4 = inlined_call_operand.vmem [shape: f32[1,128], index: 4, kind: input, shape index: {}]   ;;  %s2651_s5 = inlined_call_operand.vmem [shape: bf16[2,16,16,128], index: 5, kind: output, shape index: {}]  }
   0x1   :  { %s2221_s20 = smov 0   ;;  %s2223_s21 = smov 0  }
   0x2   :  { %s2225_s22 = smov 0  }
   0x3 LB: > { %s30_s23 = sadd.s32 1, %s2175_s20  ;;  %s34_s24 = sadd.s32 1, %s2179_s21  ;;  %s2183_s22 = sphi %s2225_s22, %s15_s22   ;;  %s2179_s21 = sphi %s2223_s21, %s2655_s21   ;;  %s2175_s20 = sphi %s2221_s20, %s2654_s20   ;;  %s2171_s19 = sphi %s2219_s19, %s2653_s19   ;;  %s2167_s18 = sphi %s2217_s18, %s2652_s18  }
   0x4   : > { %p32_p0 = scmp.ge.s32.totalorder %s30_s23, 16  ;;  %p1669_p1 = scmp.ge.s32.totalorder %s2183_s22, 1 }
   0x5   : > { %p273_p2 = scmp.lt.s32.totalorder %s2183_s22, 33 }
   0x6   : > { %s2657_s23 = smov (%p32_p0, %s30_s23), 0  ;;  %s2659_s24 = smov (!%p32_p0, %s34_s24), %s2179_s21 }
   0x7   : > { %p274_p3 = pnand %p1669_p1, %p273_p2  ;;  %p36_p4 = scmp.ge.s32.totalorder %s2659_s24, 2 }
   0x8   : > { %v2073_v0 = vld [vmem:[%s2649_s3 + $0x40] sm:$0xff] (!%p274_p3)   ;;  %v2185_v1 = vmov (!%p274_p3), 0.0   ;;  %v2075_v3 = vld [vmem:[%s2649_s3 + $0x48] sm:$0xff] (!%p274_p3)   ;;  %vm2186_vm0 = vmmov (!%p274_p3), 0   ;;  %p339_p5 = scmp.lt.s32.totalorder (!%p274_p3), %s2171_s19, 1  ;;  %p341_p6 = scmp.lt.s32.totalorder (!%p274_p3), %s2167_s18, 17 }
   0x9   : > { %s2661_s24 = smov (%p36_p4, %s2659_s24), 0  ;;  %277 = sbr.rel (%p274_p3) target bundleno = 391 (0x187), region = 40 }
   0xa   : > { %1847 = vmatprep.subr.bf16.mxu0 (!%p274_p3), %v2185_v1  ;;  %1867 = vmatprep.subr.bf16.mxu1 (!%p274_p3), %v2185_v1  ;;  %v2074_v2 = vld [vmem:[%s2649_s3] sm:$0xff] (!%p274_p3)   ;;  %v2076_v4 = vld [vmem:[%s2649_s3 + $0x8] sm:$0xff] (!%p274_p3)   ;;  %v2077_v5 = vld [vmem:[%s2649_s3 + $0x50] sm:$0xff] (!%p274_p3)   ;;  %s348_s26 = sadd.s32 (!%p274_p3), 1, %s2167_s18  ;;  %vm443_vm4 = vsmask.f32 (!%p274_p3), 7424 }
   0xb   : > { %1848 = vmatpush3.bf16.msra.mxu0 (!%p274_p3), %v2073_v0  ;;  %1863 = vmatprep.mubr.msk.bf16.mxu0 (!%p274_p3), %vm2186_vm0, %v2185_v1  ;;  %v2078_v6 = vld [vmem:[%s2649_s3 + $0x10] sm:$0xff] (!%p274_p3)   ;;  %v2079_v7 = vld [vmem:[%s2649_s3 + $0x58] sm:$0xff] (!%p274_p3)   ;;  %v2081_v9 = vld [vmem:[%s2649_s3 + $0x60] sm:$0xff] (!%p274_p3)   ;;  %p351_p7 = scmp.lt.s32.totalorder (!%p274_p3), %s348_s26, 17  ;;  %s359_s6 = sadd.s32 (!%p274_p3), 2, %s2167_s18  ;;  %vm652_vm7 = vcmask (!%p274_p3), 1046528  }
   0xc   : > { %1868 = vmatpush3.bf16.msra.mxu1 (!%p274_p3), %v2074_v2  ;;  %1849 = vmatprep.subr.bf16.mxu0 (!%p274_p3), %v2185_v1  ;;  %v2080_v8 = vld [vmem:[%s2649_s3 + $0x18] sm:$0xff] (!%p274_p3)   ;;  %v2082_v10 = vld [vmem:[%s2649_s3 + $0x20] sm:$0xff] (!%p274_p3)   ;;  %v2083_v15 = vld [vmem:[%s2649_s3 + $0x68] sm:$0xff] (!%p274_p3)   ;;  %p362_p8 = scmp.lt.s32.totalorder (!%p274_p3), %s359_s6, 17  ;;  %p379_p9 = scmp.lt.s32.totalorder (!%p274_p3), %s2167_s18, 15 }
   0xd   : > { %1869 = vmatprep.subr.bf16.mxu1 (!%p274_p3), %v2185_v1  ;;  %1883 = vmatprep.mubr.msk.bf16.mxu1 (!%p274_p3), %vm2186_vm0, %v2185_v1  ;;  %v2084_v16 = vld [vmem:[%s2649_s3 + $0x28] sm:$0xff] (!%p274_p3)   ;;  %v2085_v24 = vld [vmem:[%s2649_s3 + $0x70] sm:$0xff] (!%p274_p3)   ;;  %v2087_v29 = vld [vmem:[%s2649_s3 + $0x78] sm:$0xff] (!%p274_p3)  }
   0xe   : > { %v2086_v25 = vld [vmem:[%s2649_s3 + $0x30] sm:$0xff] (!%p274_p3)   ;;  %v2088_v31 = vld [vmem:[%s2649_s3 + $0x38] sm:$0xff] (!%p274_p3)   ;;  %v2089_v35 = vld [vmem:[%s2649_s3 + $0x80] sm:$0xff] (!%p274_p3)  }
   0xf   : > { %1850 = vmatpush3.bf16.msra.mxu0 (!%p274_p3), %v2075_v3  ;;  %v2090_v36 = vld [vmem:[%s2649_s3 + $0xc0] sm:$0xff] (!%p274_p3)   ;;  %v2091_v37 = vld [vmem:[%s2649_s3 + $0x88] sm:$0xff] (!%p274_p3)   ;;  %v2093_v39 = vld [vmem:[%s2649_s3 + $0x90] sm:$0xff] (!%p274_p3)  }
  0x10   : > { %s2663_s19 = smov (!%p339_p5, %s2171_s19), 1  ;;  %1870 = vmatpush3.bf16.msra.mxu1 %v2076_v4  ;;  %1851 = vmatprep.subr.bf16.mxu0 %v2185_v1  ;;  %s2665_s26 = smov (!%p351_p7, %s348_s26), 17  ;;  %v2092_v38 = vld [vmem:[%s2649_s3 + $0xc8] sm:$0xff]   ;;  %v2094_v40 = vld [vmem:[%s2649_s3 + $0xd0] sm:$0xff]   ;;  %v2095_v41 = vld [vmem:[%s2649_s3 + $0x98] sm:$0xff]  }
  0x11   : > { %s342_s8 = scalar_select %p341_p6, %s2167_s18, 17  ;;  %1871 = vmatprep.subr.bf16.mxu1 %v2185_v1  ;;  %v2096_v42 = vld [vmem:[%s2649_s3 + $0xd8] sm:$0xff]   ;;  %v2097_v43 = vld [vmem:[%s2649_s3 + $0xa0] sm:$0xff]   ;;  %v2099_v45 = vld [vmem:[%s2649_s3 + $0xa8] sm:$0xff]  }
  0x12   : > { %s2281_s11 = smul.u32 54, %s2663_s19  ;;  %v2098_v44 = vld [vmem:[%s2649_s3 + $0xe0] sm:$0xff]   ;;  %s2667_s6 = smov (!%p362_p8, %s359_s6), 17  ;;  %v2100_v46 = vld [vmem:[%s2649_s3 + $0xe8] sm:$0xff]   ;;  %v2101_v49 = vld [vmem:[%s2649_s3 + $0xb0] sm:$0xff]  }
  0x13   : > { %s2027_s14 = smul.u32 3, %s342_s8  ;;  %1852 = vmatpush3.bf16.msra.mxu0 %v2077_v5  ;;  %v2102_v50 = vld [vmem:[%s2649_s3 + $0xf0] sm:$0xff]   ;;  %v2103_v54 = vld [vmem:[%s2649_s3 + $0xb8] sm:$0xff]   ;;  %v2105_v60 = vld [vmem:[%s2649_s3 + $0x100] sm:$0xff]   ;;  %s2669_s18 = smov (!%p379_p9, %s2167_s18), 15 }
  0x14   : > { %1872 = vmatpush3.bf16.msra.mxu1 %v2078_v6  ;;  %1853 = vmatprep.subr.bf16.mxu0 %v2185_v1  ;;  %s2029_s17 = smul.u32 3, %s2665_s26  ;;  %v2104_v56 = vld [vmem:[%s2649_s3 + $0xf8] sm:$0xff]   ;;  %v2106_v62 = vld [vmem:[%s2649_s3 + $0x140] sm:$0xff]   ;;  %v2107_v63 = vld [vmem:[%s2649_s3 + $0x108] sm:$0xff]   ;;  %s1674_s9 = sshll.u32 %s2663_s19, 5 }
  0x15   : > { %s345_s15 = sadd.s32 %s2281_s11, %s2027_s14  ;;  %1873 = vmatprep.subr.bf16.mxu1 %v2185_v1  ;;  %s2030_s29 = smul.u32 3, %s2667_s6  ;;  %v2108_v0 = vld [vmem:[%s2649_s3 + $0x148] sm:$0xff]   ;;  %v2109_v3 = vld [vmem:[%s2649_s3 + $0x110] sm:$0xff]  }
  0x16   : > { %s1670_s25 = sshll.u32 %s345_s15, 2  ;;  %s1673_s6 = sshll.u32 %s2669_s18, 1 }
  0x17   : > { %s347_s30 = scalar_lea.vmem %s2646_s0, %s1670_s25  ;;  %1854 = vmatpush3.bf16.msra.mxu0 %v2079_v7  ;;  %s366_s13 = sadd.s32 %s2030_s29, %s2281_s11  ;;  %v2110_v7 = vld [vmem:[%s2649_s3 + $0x150] sm:$0xff]  }
  0x18   : > { %1874 = vmatpush3.bf16.msra.mxu1 %v2080_v8  ;;  %1855 = vmatprep.subr.bf16.mxu0 %v2185_v1  ;;  %v391_v11 = vld [vmem:[%s347_s30] sm:$0xf]  ;;  %v392_v12 = vld [vmem:[%s347_s30 + $0x4] sm:$0xf]  ;;  %v393_v13 = vld [vmem:[%s347_s30 + $0x8] sm:$0x1]  ;;  %s355_s30 = sadd.s32 %s2029_s17, %s2281_s11  ;;  %s386_s10 = sadd.s32 %s1674_s9, %s1673_s6 }
  0x19   : > { %1875 = vmatprep.subr.bf16.mxu1 %v2185_v1  ;;  %vm394_vm1 = vcmp.ge.bf16.partialorder %v391_v11, 0  ;;  %vm395_vm2 = vcmp.ge.bf16.partialorder %v392_v12, 0  ;;  %vm396_vm3 = vcmp.ge.bf16.partialorder %v393_v13, 0  ;;  %v397_v14 = vmul.bf16 1045249613, %v391_v11  ;;  %s1671_s8 = sshll.u32 %s355_s30, 2 }
  0x1a   : > { %v398_v17 = vmul.bf16 1045249613, %v392_v12  ;;  %v399_v18 = vmul.bf16 1045249613, %v393_v13  ;;  %s2391_s16 = scalar_lea.vmem %s2647_s1, %s1671_s8  ;;  %s1672_s27 = sshll.u32 %s366_s13, 2 }
  0x1b   : > { %1856 = vmatpush3.bf16.msra.mxu0 %v2081_v9  ;;  %v400_v19 = vsel %vm394_vm1, %v391_v11, %v397_v14  ;;  %v748_v47 = vld [vmem:[%s2391_s16] sm:$0xf]  ;;  %v749_v48 = vld [vmem:[%s2391_s16 + $0x4] sm:$0xf]  ;;  %s368_s26 = scalar_lea.vmem %s2648_s2, %s1672_s27  ;;  %v750_v4 = vld [vmem:[%s2391_s16 + $0x8] sm:$0x1] }
  0x1c   : > { %1876 = vmatpush3.bf16.msra.mxu1 %v2082_v10  ;;  %1857 = vmatprep.subr.bf16.mxu0 %v2185_v1  ;;  %v401_v20 = vsel %vm395_vm2, %v392_v12, %v398_v17  ;;  %v402_v21 = vsel %vm396_vm3, %v393_v13, %v399_v18  ;;  %v754_v51 = vmul.bf16 1045249613, %v748_v47  ;;  %v755_v52 = vmul.bf16 1045249613, %v749_v48  ;;  %v1107_v2 = vld [vmem:[%s368_s26] sm:$0xf] }
  0x1d   : > { %1877 = vmatprep.subr.bf16.mxu1 %v2185_v1  ;;  %v2316_v22 = vcombine.low %v400_v19, %v401_v20  ;;  %v2318_v23 = vcombine.low %v402_v21, %v402_v21  ;;  %vm751_vm5 = vcmp.ge.bf16.partialorder %v748_v47, 0  ;;  %vm752_vm6 = vcmp.ge.bf16.partialorder %v749_v48, 0  ;;  %v1108_v5 = vld [vmem:[%s368_s26 + $0x4] sm:$0xf]  ;;  %v2111_v9 = vld [vmem:[%s2649_s3 + $0x118] sm:$0xff]   ;;  %s1675_s14 = sshll.u32 %s386_s10, 2 }
  0x1e   : > { %v757_v57 = vsel %vm751_vm5, %v748_v47, %v754_v51  ;;  %v758_v58 = vsel %vm752_vm6, %v749_v48, %v755_v52  ;;  %vm1110_vm8 = vcmp.ge.bf16.partialorder %v1107_v2, 0  ;;  %v1113_v6 = vmul.bf16 1045249613, %v1107_v2  ;;  %v1109_v11 = vld [vmem:[%s368_s26 + $0x8] sm:$0x1]  ;;  %v2112_v12 = vld [vmem:[%s2649_s3 + $0x158] sm:$0xff]   ;;  %s388_s17 = scalar_lea.vmem %s2651_s5, %s1675_s14 }
  0x1f   : > { %1858 = vmatpush3.bf16.msra.mxu0 %v2083_v15  ;;  %v445_v26 = vshrl.u32 %v2316_v22, 16  ;;  %v447_v27 = vshll.u32 %v2316_v22, 16  ;;  %v452_v28 = vshll.u32 %v2318_v23, 16  ;;  %v653_v53 = vrot.slane %v2316_v22, 1  ;;  %v2113_v21 = vld [vmem:[%s2649_s3 + $0x120] sm:$0xff]   ;;  %v2123_v51 = vld [vmem:[%s2649_s3 + $0x188] sm:$0xff]  }
  0x20   : > { %1878 = vmatpush3.bf16.msra.mxu1 %v2084_v16  ;;  %1859 = vmatprep.subr.bf16.mxu0 %v2185_v1  ;;  %v654_v55 = vrot.slane %v2318_v23, 1  ;;  %v2429_v61 = vcombine.low %v757_v57, %v758_v58  ;;  %vm1111_vm9 = vcmp.ge.bf16.partialorder %v1108_v5, 0  ;;  %v1114_v8 = vmul.bf16 1045249613, %v1108_v5  ;;  %v2121_v48 = vld [vmem:[%s2649_s3 + $0x180] sm:$0xff]   ;;  %v2124_v52 = vld [vmem:[%s2649_s3 + $0x1c8] sm:$0xff]  }
  0x21   : > { %1879 = vmatprep.subr.bf16.mxu1 %v2185_v1  ;;  %v449_v30 = vrot.slane %v447_v27, 1  ;;  %v454_v32 = vrot.slane %v452_v28, 1  ;;  %v1116_v10 = vsel %vm1110_vm8, %v1107_v2, %v1113_v6  ;;  %vm1112_vm10 = vcmp.ge.bf16.partialorder %v1109_v11, 0  ;;  %v2129_v57 = vld [vmem:[%s2649_s3 + $0x1a0] sm:$0xff]  }
  0x22   : > { %v655_v59 = vsel %vm652_vm7, %v653_v53, %v654_v55  ;;  %v1117_v13 = vsel %vm1111_vm9, %v1108_v5, %v1114_v8  ;;  %v1115_v14 = vmul.bf16 1045249613, %v1109_v11  ;;  %v756_v16 = vmul.bf16 1045249613, %v750_v4  ;;  %v2125_v53 = vld [vmem:[%s2649_s3 + $0x190] sm:$0xff]   ;;  %v2127_v55 = vld [vmem:[%s2649_s3 + $0x198] sm:$0xff]  }
  0x23   : > { %1860 = vmatpush3.bf16.msra.mxu0 %v2085_v24  ;;  %v450_v33 = vor.u32 %v449_v30, %v445_v26  ;;  %v2467_v15 = vcombine.low %v1116_v10, %v1117_v13  ;;  %vm753_vm11 = vcmp.ge.bf16.partialorder %v750_v4, 0  ;;  %v2130_v58 = vld [vmem:[%s2649_s3 + $0x1e0] sm:$0xff]   ;;  %v2140_v5 = vld [vmem:[%s2649_s3 + $0x218] sm:$0xff]   ;;  %v2143_v8 = vld [vmem:[%s2649_s3 + $0x230] sm:$0xff]  }
  0x24   : > { %1880 = vmatpush3.bf16.msra.mxu1 %v2086_v25  ;;  %1861 = vmatprep.subr.bf16.mxu0 %v2185_v1  ;;  %v1118_v17 = vsel %vm1112_vm10, %v1109_v11, %v1115_v14  ;;  %v759_v25 = vsel %vm753_vm11, %v750_v4, %v756_v16  ;;  %v2137_v2 = vld [vmem:[%s2649_s3 + $0x200] sm:$0xff]   ;;  %v2139_v4 = vld [vmem:[%s2649_s3 + $0x210] sm:$0xff]  }
  0x25   : > { %1881 = vmatprep.subr.bf16.mxu1 %v2185_v1  ;;  %v455_v34 = vsel %vm443_vm4, %v450_v33, %v454_v32  ;;  %v1737_v18 = vcombine.low %v1118_v17, %v1118_v17  ;;  %v1252_v19 = vshrl.u32 %v2467_v15, 16  ;;  %v1254_v20 = vshll.u32 %v2467_v15, 16  ;;  %v2141_v6 = vld [vmem:[%s2649_s3 + $0x220] sm:$0xff]  }
  0x26   : > { %v1371_v26 = vrot.slane %v2467_v15, 1  ;;  %v1711_v32 = vcombine.low %v759_v25, %v759_v25  ;;  %v895_v33 = vshll.u32 %v2429_v61, 16 }
  0x27   : > { %1862 = vmatpush3.bf16.msra.mxu0 %v2087_v29  ;;  %v1256_v23 = vrot.slane %v1254_v20, 1  ;;  %v1259_v24 = vshll.u32 %v1737_v18, 16  ;;  %v1372_v27 = vrot.slane %v1737_v18, 1 }
  0x28   : > { %1882 = vmatpush3.bf16.msra.mxu1 %v2088_v31  ;;  %1887 = vmatprep.subr.bf16.mxu0 %v2185_v1  ;;  %v2115_v31 = vld [vmem:[%s2649_s3 + $0x128] sm:$0xff]  }
  0x29   : > { %1907 = vmatprep.subr.bf16.mxu1 %v2185_v1  ;;  %v1257_v28 = vor.u32 %v1256_v23, %v1252_v19  ;;  %v1261_v29 = vrot.slane %v1259_v24, 1  ;;  %v2483_v30 = vsel %vm652_vm7, %v1371_v26, %v1372_v27 }
  0x2a   : > { %1864 = vmatmul.mubr.bf16.vlgmr.msra.gmra.mrb[0].mxu0 %v455_v34 }
  0x2b   : > { %1884 = vmatmul.mubr.bf16.vlgmr.msra.gmra.mrb[0].mxu1 %v2316_v22  ;;  %1888 = vmatpush3.bf16.msra.mxu0 %v2089_v35  ;;  %v2114_v22 = vld [vmem:[%s2649_s3 + $0x160] sm:$0xff]   ;;  %v2490_v34 = vsel %vm443_vm4, %v1257_v28, %v1261_v29  ;;  %v2116_v35 = vld [vmem:[%s2649_s3 + $0x168] sm:$0xff]  }
  0x2c   : > { %1908 = vmatpush3.bf16.msra.mxu1 %v2090_v36  ;;  %1889 = vmatprep.subr.bf16.mxu0 %v2185_v1  ;;  %v2117_v36 = vld [vmem:[%s2649_s3 + $0x130] sm:$0xff]  }
  0x2d   : > { %1909 = vmatprep.subr.bf16.mxu1 %v2185_v1  ;;  %1903 = vmatprep.mubr.msk.bf16.mxu0 %vm2186_vm0, %v2185_v1 }
  0x2e   : > { %1923 = vmatprep.mubr.msk.bf16.mxu1 %vm2186_vm0, %v2185_v1 }
  0x2f   : > { %1890 = vmatpush3.bf16.msra.mxu0 %v2091_v37  ;;  %v893_v37 = vshrl.u32 %v2429_v61, 16 }
  0x30   : > { %1910 = vmatpush3.bf16.msra.mxu1 %v2092_v38  ;;  %1891 = vmatprep.subr.bf16.mxu0 %v2185_v1  ;;  %v897_v38 = vrot.slane %v895_v33, 1 }
  0x31   : > { %1911 = vmatprep.subr.bf16.mxu1 %v2185_v1 }
  0x33   : > { %1892 = vmatpush3.bf16.msra.mxu0 %v2093_v39  ;;  %v900_v39 = vshll.u32 %v1711_v32, 16 }
  0x34   : > { %1912 = vmatpush3.bf16.msra.mxu1 %v2094_v40  ;;  %1893 = vmatprep.subr.bf16.mxu0 %v2185_v1  ;;  %v2118_v40 = vld [vmem:[%s2649_s3 + $0x170] sm:$0xff]  }
  0x35   : > { %1913 = vmatprep.subr.bf16.mxu1 %v2185_v1 }
  0x37   : > { %1894 = vmatpush3.bf16.msra.mxu0 %v2095_v41  ;;  %v2119_v41 = vld [vmem:[%s2649_s3 + $0x138] sm:$0xff]  }
  0x38   : > { %1914 = vmatpush3.bf16.msra.mxu1 %v2096_v42  ;;  %1895 = vmatprep.subr.bf16.mxu0 %v2185_v1  ;;  %v898_v42 = vor.u32 %v897_v38, %v893_v37 }
  0x39   : > { %1915 = vmatprep.subr.bf16.mxu1 %v2185_v1 }
  0x3b   : > { %1896 = vmatpush3.bf16.msra.mxu0 %v2097_v43  ;;  %v902_v43 = vrot.slane %v900_v39, 1 }
  0x3c   : > { %1916 = vmatpush3.bf16.msra.mxu1 %v2098_v44  ;;  %1897 = vmatprep.subr.bf16.mxu0 %v2185_v1  ;;  %v2120_v44 = vld [vmem:[%s2649_s3 + $0x178] sm:$0xff]  }
  0x3d   : > { %1917 = vmatprep.subr.bf16.mxu1 %v2185_v1  ;;  %v903_v47 = vsel %vm443_vm4, %v898_v42, %v902_v43 }
  0x3f   : > { %1898 = vmatpush3.bf16.msra.mxu0 %v2099_v45  ;;  %v1012_v45 = vrot.slane %v2429_v61, 1 }
  0x40   : > { %1918 = vmatpush3.bf16.msra.mxu1 %v2100_v46  ;;  %1899 = vmatprep.subr.bf16.mxu0 %v2185_v1  ;;  %v1013_v46 = vrot.slane %v1711_v32, 1 }
  0x41   : > { %1919 = vmatprep.subr.bf16.mxu1 %v2185_v1 }
  0x43   : > { %1900 = vmatpush3.bf16.msra.mxu0 %v2101_v49  ;;  %v1014_v49 = vsel %vm652_vm7, %v1012_v45, %v1013_v46 }
  0x44   : > { %1920 = vmatpush3.bf16.msra.mxu1 %v2102_v50  ;;  %1901 = vmatprep.subr.bf16.mxu0 %v2185_v1  ;;  %v2122_v50 = vld [vmem:[%s2649_s3 + $0x1c0] sm:$0xff]  }
  0x45   : > { %1921 = vmatprep.subr.bf16.mxu1 %v2185_v1 }
  0x47   : > { %1902 = vmatpush3.bf16.msra.mxu0 %v2103_v54  ;;  %v2126_v54 = vld [vmem:[%s2649_s3 + $0x1d0] sm:$0xff]  }
  0x48   : > { %1922 = vmatpush3.bf16.msra.mxu1 %v2104_v56  ;;  %1927 = vmatprep.subr.bf16.mxu0 %v2185_v1  ;;  %v2128_v56 = vld [vmem:[%s2649_s3 + $0x1d8] sm:$0xff]  }
  0x49   : > { %1947 = vmatprep.subr.bf16.mxu1 %v2185_v1 }
  0x4a   : > { %1904 = vmatmul.mubr.bf16.vlgmr.msra.gmra.mrb[4].mxu0 %v655_v59  ;;  %v2131_v59 = vld [vmem:[%s2649_s3 + $0x1a8] sm:$0xff]  }
  0x4b   : > { %1928 = vmatpush3.bf16.msra.mxu0 %v2105_v60  ;;  %1924 = vmatmul.mubr.bf16.vlgmr.msra.gmra.mrb[4].mxu1 %v2429_v61  ;;  %v2132_v60 = vld [vmem:[%s2649_s3 + $0x1e8] sm:$0xff]   ;;  %v2133_v61 = vld [vmem:[%s2649_s3 + $0x1b0] sm:$0xff]  }
  0x4c   : > { %1948 = vmatpush3.bf16.msra.mxu1 %v2106_v62  ;;  %1929 = vmatprep.subr.bf16.mxu0 %v2185_v1  ;;  %v2134_v62 = vld [vmem:[%s2649_s3 + $0x1f0] sm:$0xff]  }
  0x4d   : > { %1949 = vmatprep.subr.bf16.mxu1 %v2185_v1  ;;  %1943 = vmatprep.mubr.msk.bf16.mxu0 %vm2186_vm0, %v2185_v1 }
  0x4e   : > { %1963 = vmatprep.mubr.msk.bf16.mxu1 %vm2186_vm0, %v2185_v1 }
  0x4f   : > { %1930 = vmatpush3.bf16.msra.mxu0 %v2107_v63  ;;  %v2135_v63 = vld [vmem:[%s2649_s3 + $0x1b8] sm:$0xff]  }
  0x50   : > { %1950 = vmatpush3.bf16.msra.mxu1 %v2108_v0  ;;  %1931 = vmatprep.subr.bf16.mxu0 %v2185_v1  ;;  %v2136_v0 = vld [vmem:[%s2649_s3 + $0x1f8] sm:$0xff]  }
  0x51   : > { %1951 = vmatprep.subr.bf16.mxu1 %v2185_v1 }
  0x53   : > { %1932 = vmatpush3.bf16.msra.mxu0 %v2109_v3  ;;  %v2138_v3 = vld [vmem:[%s2649_s3 + $0x208] sm:$0xff]  }
  0x54   : > { %1952 = vmatpush3.bf16.msra.mxu1 %v2110_v7  ;;  %1933 = vmatprep.subr.bf16.mxu0 %v2185_v1  ;;  %v2142_v7 = vld [vmem:[%s2649_s3 + $0x228] sm:$0xff]  }
  0x55   : > { %1953 = vmatprep.subr.bf16.mxu1 %v2185_v1 }
  0x57   : > { %1934 = vmatpush3.bf16.msra.mxu0 %v2111_v9  ;;  %v2144_v9 = vld [vmem:[%s2649_s3 + $0x238] sm:$0xff]  }
  0x58   : > { %1954 = vmatpush3.bf16.msra.mxu1 %v2112_v12  ;;  %1935 = vmatprep.subr.bf16.mxu0 %v2185_v1 }
  0x59   : > { %1955 = vmatprep.subr.bf16.mxu1 %v2185_v1 }
  0x5b   : > { %1936 = vmatpush3.bf16.msra.mxu0 %v2113_v21 }
  0x5c   : > { %1956 = vmatpush3.bf16.msra.mxu1 %v2114_v22  ;;  %1937 = vmatprep.subr.bf16.mxu0 %v2185_v1 }
  0x5d   : > { %1957 = vmatprep.subr.bf16.mxu1 %v2185_v1 }
  0x5f   : > { %1938 = vmatpush3.bf16.msra.mxu0 %v2115_v31 }
  0x60   : > { %1958 = vmatpush3.bf16.msra.mxu1 %v2116_v35  ;;  %1939 = vmatprep.subr.bf16.mxu0 %v2185_v1 }
  0x61   : > { %1959 = vmatprep.subr.bf16.mxu1 %v2185_v1 }
  0x63   : > { %1940 = vmatpush3.bf16.msra.mxu0 %v2117_v36 }
  0x64   : > { %1960 = vmatpush3.bf16.msra.mxu1 %v2118_v40  ;;  %1941 = vmatprep.subr.bf16.mxu0 %v2185_v1 }
  0x65   : > { %1961 = vmatprep.subr.bf16.mxu1 %v2185_v1 }
  0x67   : > { %1942 = vmatpush3.bf16.msra.mxu0 %v2119_v41 }
  0x68   : > { %1962 = vmatpush3.bf16.msra.mxu1 %v2120_v44  ;;  %1967 = vmatprep.subr.bf16.mxu0 %v2185_v1 }
  0x69   : > { %1987 = vmatprep.subr.bf16.mxu1 %v2185_v1 }
  0x6a   : > { %1944 = vmatmul.mubr.bf16.vlgmr.msra.gmra.mrb[8].mxu0 %v903_v47 }
  0x6b   : > { %1968 = vmatpush3.bf16.msra.mxu0 %v2121_v48  ;;  %1964 = vmatmul.mubr.bf16.vlgmr.msra.gmra.mrb[8].mxu1 %v1014_v49 }
  0x6c   : > { %1988 = vmatpush3.bf16.msra.mxu1 %v2122_v50  ;;  %1969 = vmatprep.subr.bf16.mxu0 %v2185_v1 }
  0x6d   : > { %1989 = vmatprep.subr.bf16.mxu1 %v2185_v1  ;;  %1983 = vmatprep.mubr.msk.bf16.mxu0 %vm2186_vm0, %v2185_v1 }
  0x6e   : > { %2003 = vmatprep.mubr.msk.bf16.mxu1 %vm2186_vm0, %v2185_v1 }
  0x6f   : > { %1970 = vmatpush3.bf16.msra.mxu0 %v2123_v51 }
  0x70   : > { %1990 = vmatpush3.bf16.msra.mxu1 %v2124_v52  ;;  %1971 = vmatprep.subr.bf16.mxu0 %v2185_v1 }
  0x71   : > { %1991 = vmatprep.subr.bf16.mxu1 %v2185_v1 }
  0x73   : > { %1972 = vmatpush3.bf16.msra.mxu0 %v2125_v53 }
  0x74   : > { %1992 = vmatpush3.bf16.msra.mxu1 %v2126_v54  ;;  %1973 = vmatprep.subr.bf16.mxu0 %v2185_v1 }
  0x75   : > { %1993 = vmatprep.subr.bf16.mxu1 %v2185_v1 }
  0x77   : > { %1974 = vmatpush3.bf16.msra.mxu0 %v2127_v55 }
  0x78   : > { %1994 = vmatpush3.bf16.msra.mxu1 %v2128_v56  ;;  %1975 = vmatprep.subr.bf16.mxu0 %v2185_v1 }
  0x79   : > { %1995 = vmatprep.subr.bf16.mxu1 %v2185_v1 }
  0x7b   : > { %1976 = vmatpush3.bf16.msra.mxu0 %v2129_v57 }
  0x7c   : > { %1996 = vmatpush3.bf16.msra.mxu1 %v2130_v58  ;;  %1977 = vmatprep.subr.bf16.mxu0 %v2185_v1  ;;  %v1754_v58 = vld [vmem:[%s2650_s4] ss:$0 sm:$0xff] }
  0x7d   : > { %1997 = vmatprep.subr.bf16.mxu1 %v2185_v1 }
  0x7f   : > { %1978 = vmatpush3.bf16.msra.mxu0 %v2131_v59 }
  0x80   : > { %1998 = vmatpush3.bf16.msra.mxu1 %v2132_v60  ;;  %1979 = vmatprep.subr.bf16.mxu0 %v2185_v1 }
  0x81   : > { %1999 = vmatprep.subr.bf16.mxu1 %v2185_v1 }
  0x83   : > { %1980 = vmatpush3.bf16.msra.mxu0 %v2133_v61 }
  0x84   : > { %2000 = vmatpush3.bf16.msra.mxu1 %v2134_v62  ;;  %1981 = vmatprep.subr.bf16.mxu0 %v2185_v1 }
  0x85   : > { %2001 = vmatprep.subr.bf16.mxu1 %v2185_v1 }
  0x87   : > { %1982 = vmatpush3.bf16.msra.mxu0 %v2135_v63 }
  0x88   : > { %2002 = vmatpush3.bf16.msra.mxu1 %v2136_v0  ;;  %2007 = vmatprep.subr.bf16.mxu0 %v2185_v1 }
  0x8a   : > { %1984 = vmatmul.mubr.bf16.vlgmr.msra.gmra.mrb[12].mxu0 %v2467_v15 }
  0x8b   : > { %2008 = vmatpush3.bf16.msra.mxu0 %v2137_v2  ;;  %2004 = vmatmul.mubr.bf16.vlgmr.msra.gmra.mrb[12].mxu1 %v2490_v34 }
  0x8c   : > { %2009 = vmatprep.subr.bf16.mxu0 %v2185_v1  ;;  %2023 = vmatprep.mubr.msk.bf16.mxu0 %vm2186_vm0, %v2185_v1 }
  0x8f   : > { %2010 = vmatpush3.bf16.msra.mxu0 %v2138_v3 }
  0x90   : > { %2011 = vmatprep.subr.bf16.mxu0 %v2185_v1 }
  0x93   : > { %2012 = vmatpush3.bf16.msra.mxu0 %v2139_v4 }
  0x94   : > { %2013 = vmatprep.subr.bf16.mxu0 %v2185_v1 }
  0x97   : > { %2014 = vmatpush3.bf16.msra.mxu0 %v2140_v5 }
  0x98   : > { %2015 = vmatprep.subr.bf16.mxu0 %v2185_v1 }
  0x9b   : > { %2016 = vmatpush3.bf16.msra.mxu0 %v2141_v6 }
  0x9c   : > { %2017 = vmatprep.subr.bf16.mxu0 %v2185_v1 }
  0x9f   : > { %2018 = vmatpush3.bf16.msra.mxu0 %v2142_v7 }
  0xa0   : > { %2019 = vmatprep.subr.bf16.mxu0 %v2185_v1 }
  0xa3   : > { %2020 = vmatpush3.bf16.msra.mxu0 %v2143_v8 }
  0xa4   : > { %2021 = vmatprep.subr.bf16.mxu0 %v2185_v1 }
  0xa7   : > { %2022 = vmatpush3.bf16.msra.mxu0 %v2144_v9 }
  0xaa   : > { %2024 = vmatmul.mubr.bf16.vlgmr.msra.gmra.mrb[16].mxu0 %v2483_v30 }
  0xfd   : > { %v539_v10 = vpop.f32.mrb[0].mxu0 }
  0xfe   : > { %v629_v11 = vpop.f32.mrb[0].mxu1  ;;  %v1865_v12 = vpop.f32.mrb[1].mxu0 }
  0xff   : > { %v630_v13 = vadd.f32 %v629_v11, %v539_v10  ;;  %v1885_v14 = vpop.f32.mrb[1].mxu1  ;;  %v542_v15 = vpop.f32.mrb[2].mxu0 }
 0x100   : > { %v632_v16 = vpop.f32.mrb[2].mxu1  ;;  %v1866_v17 = vpop.f32.mrb[3].mxu0 }
 0x101   : > { %v633_v18 = vadd.f32 %v632_v16, %v542_v15  ;;  %v1886_v19 = vpop.f32.mrb[3].mxu1 }
 0x11d   : > { %v739_v20 = vpop.f32.mrb[4].mxu0 }
 0x11e   : > { %v746_v21 = vadd.f32 %v739_v20, %v630_v13  ;;  %v1905_v22 = vpop.f32.mrb[5].mxu0  ;;  %v864_v23 = vpop.f32.mrb[4].mxu1 }
 0x11f   : > { %v742_v24 = vpop.f32.mrb[6].mxu0  ;;  %v1925_v25 = vpop.f32.mrb[5].mxu1 }
 0x120   : > { %v747_v1 = vadd.f32 %v742_v24, %v633_v18  ;;  %v871_v26 = vadd.f32 %v864_v23, %v746_v21  ;;  %v1906_v27 = vpop.f32.mrb[7].mxu0  ;;  %v867_v28 = vpop.f32.mrb[6].mxu1 }
 0x121   : > { %v1926_v29 = vpop.f32.mrb[7].mxu1 }
 0x122   : > { %v872_v30 = vadd.f32 %v867_v28, %v747_v1 }
 0x13d   : > { %v987_v31 = vpop.f32.mrb[8].mxu0 }
 0x13e   : > { %v994_v32 = vadd.f32 %v987_v31, %v871_v26  ;;  %v1945_v33 = vpop.f32.mrb[9].mxu0  ;;  %v1098_v34 = vpop.f32.mrb[8].mxu1 }
 0x13f   : > { %v990_v35 = vpop.f32.mrb[10].mxu0  ;;  %v1965_v36 = vpop.f32.mrb[9].mxu1 }
 0x140   : > { %v995_v37 = vadd.f32 %v990_v35, %v872_v30  ;;  %v1105_v38 = vadd.f32 %v1098_v34, %v994_v32  ;;  %v1946_v39 = vpop.f32.mrb[11].mxu0  ;;  %v1101_v40 = vpop.f32.mrb[10].mxu1 }
 0x141   : > { %v1966_v41 = vpop.f32.mrb[11].mxu1 }
 0x142   : > { %v1106_v42 = vadd.f32 %v1101_v40, %v995_v37 }
 0x15d   : > { %v1223_v43 = vpop.f32.mrb[12].mxu0 }
 0x15e   : > { %v1230_v44 = vadd.f32 %v1223_v43, %v1105_v38  ;;  %v1985_v45 = vpop.f32.mrb[13].mxu0  ;;  %v1346_v46 = vpop.f32.mrb[12].mxu1 }
 0x15f   : > { %v1226_v47 = vpop.f32.mrb[14].mxu0  ;;  %v2005_v48 = vpop.f32.mrb[13].mxu1 }
 0x160   : > { %v1231_v49 = vadd.f32 %v1226_v47, %v1106_v42  ;;  %v1353_v50 = vadd.f32 %v1346_v46, %v1230_v44  ;;  %v1986_v51 = vpop.f32.mrb[15].mxu0  ;;  %v1349_v52 = vpop.f32.mrb[14].mxu1 }
 0x161   : > { %v2006_v53 = vpop.f32.mrb[15].mxu1 }
 0x162   : > { %v1354_v54 = vadd.f32 %v1349_v52, %v1231_v49 }
 0x17d   : > { %v1457_v55 = vpop.f32.mrb[16].mxu0 }
 0x17e   : > { %v1464_v56 = vadd.f32 %v1457_v55, %v1353_v50  ;;  %v2025_v57 = vpop.f32.mrb[17].mxu0 }
 0x17f   : > { %v1460_v59 = vpop.f32.mrb[18].mxu0 }
 0x180   : > { %v1465_v60 = vadd.f32 %v1460_v59, %v1354_v54  ;;  %v2026_v61 = vpop.f32.mrb[19].mxu0  ;;  %v1473_v62 = vadd.f32 %v1754_v58, %v1464_v56 }
 0x182   : > { %v1474_v63 = vadd.f32 %v1754_v58, %v1465_v60 }
 0x184   : > { %v1764_v0 = vpack.c.bf16 %v1474_v63, %v1473_v62 }
 0x186   : > { %1765 = vst [vmem:[%s388_s17] sm:$0xff] %v1764_v0  }
 0x187 PF: > { %s15_s22 = sadd.s32 1, %s2183_s22   ;;  %s2652_s18 = smov %s2175_s20 }
 0x188   : > { %p12_p10 = scmp.ge.s32.totalorder %s15_s22, 34   ;;  %s2653_s19 = smov %s2179_s21 }
 0x189   : > { %s2654_s20 = smov %s2657_s23  ;;  %s2655_s21 = smov %s2661_s24 }
 0x18a   :  { %14 = sbr.rel (!%p12_p10) target bundleno = 3 (0x3), region = 82 }

// kernel: _lambda_.9
= control target key start
LH: loop header
LB: loop body
LE: loop exit
PB: predicated region body
PF: predicated region fallthrough
CT: control target
= control target key end

     0   :  { %11 = vsyncpa [#allocation3], 0  ;;  %s2776_s0 = inlined_call_operand.vmem [shape: bf16[2,10,10,128], index: 0, kind: input, shape index: {}, may-alias: {0,1,2}]   ;;  %s2777_s1 = inlined_call_operand.vmem [shape: bf16[2,10,10,128], index: 1, kind: input, shape index: {}, may-alias: {0,1,2}]   ;;  %s2778_s2 = inlined_call_operand.vmem [shape: bf16[2,10,10,128], index: 2, kind: input, shape index: {}, may-alias: {0,1,2}]   ;;  %s2779_s3 = inlined_call_operand.vmem [shape: bf16[1152,128], index: 3, kind: input, shape index: {}]   ;;  %s2780_s4 = inlined_call_operand.vmem [shape: f32[1,128], index: 4, kind: input, shape index: {}]   ;;  %s2781_s5 = inlined_call_operand.vmem [shape: bf16[2,8,8,128], index: 5, kind: input, shape index: {}]   ;;  %s2782_s6 = inlined_call_operand.hbm [shape: f32[2,8,8,128], index: 6, kind: output, shape index: {}]  }
   0x1   :  { %13 = vsyncpa [#allocation3 + $0x1], 0  ;;  %s2299_s21 = smov 0   ;;  %s2301_s22 = smov 0  }
   0x2   :  { %s2303_s23 = smov 0   ;;  %s2305_s24 = smov 0  }
   0x3   :  { %s2307_s25 = smov 0   ;;  %s2309_s26 = smov 0  }
   0x4   :  { %s2311_s27 = smov 0   ;;  %s2313_s28 = smov 0  }
   0x5 LB: > { %s1661_s29 = sadd.s32 4294967295, %s2259_s28   ;;  %s1662_s30 = sadd.s32 4294967294, %s2259_s28   ;;  %s2259_s28 = sphi %s2313_s28, %s19_s28   ;;  %s2255_s27 = sphi %s2311_s27, %s2797_s27   ;;  %s2251_s26 = sphi %s2309_s26, %s2796_s26   ;;  %s2247_s25 = sphi %s2307_s25, %s2795_s25   ;;  %s2243_s24 = sphi %s2305_s24, %s2794_s24   ;;  %s2239_s23 = sphi %s2303_s23, %s2793_s23   ;;  %s2235_s22 = sphi %s2301_s22, %s2792_s22   ;;  %s2231_s21 = sphi %s2299_s21, %s2791_s21  }
   0x6   : > { %s34_s7 = sadd.s32 1, %s2251_s26  ;;  %s38_s8 = sadd.s32 1, %s2255_s27 }
   0x7   : > { %p36_p0 = scmp.ge.s32.totalorder %s34_s7, 8  ;;  %p229_p1 = scmp.ne.s32.totalorder %s2239_s23, %s2235_s22 }
   0x8   : > { %p230_p2 = scmp.eq.s32.totalorder %s1661_s29, 15  ;;  %p235_p5 = scmp.ne.s32.totalorder %s2235_s22, %s2231_s21 }
   0x9   : > { %s2799_s7 = smov (%p36_p0, %s34_s7), 0  ;;  %s2801_s8 = smov (!%p36_p0, %s38_s8), %s2255_s27 }
   0xa   : > { %2785 = sst [smem:[#allocation5_spill]] %s2799_s7  ;;  %s213_s9 = ssub.s32 %s2251_s26, %s2799_s7 }
   0xb   : > { %p2350_p3 = por %p230_p2, %p229_p1  ;;  %p40_p4 = scmp.ge.s32.totalorder %s2801_s8, 2 }
   0xc   : > { %p236_p6 = scmp.eq.s32.totalorder %s1662_s30, 15  ;;  %p1667_p7 = scmp.ge.s32.totalorder %s2259_s28, 1 }
   0xd   : > { %s2803_s8 = smov (%p40_p4, %s2801_s8), 0  ;;  %p321_p9 = scmp.lt.s32.totalorder %s2259_s28, 17 }
   0xe   : > { %2787 = sst [smem:[#allocation6_spill]] %s2803_s8  ;;  %p2359_p8 = por %p236_p6, %p235_p5 }
   0xf   : > { %s212_s12 = ssub.s32 %s2255_s27, %s2803_s8  ;;  %s219_s13 = sadd.s32 1, %s2239_s23 }
  0x10   : > { %s214_s14 = sor.u32 %s213_s9, %s212_s12  ;;  %p322_p10 = pnand %p1667_p7, %p321_p9 }
  0x11   : > { %p217_p11 = scmp.eq.s32.totalorder %s214_s14, 0  ;;  %v2093_v0 = vld [vmem:[%s2779_s3 + $0x40] sm:$0xff] (!%p322_p10)   ;;  %v2261_v1 = vmov (!%p322_p10), 0.0   ;;  %v2095_v3 = vld [vmem:[%s2779_s3 + $0x48] sm:$0xff] (!%p322_p10)   ;;  %vm2262_vm0 = vmmov (!%p322_p10), 0   ;;  %p393_p12 = scmp.lt.s32.totalorder (!%p322_p10), %s2247_s25, 1 }
  0x12   : > { %325 = sbr.rel (%p322_p10) target bundleno = 413 (0x19d), region = 44  ;;  %1839 = vmatprep.subr.bf16.mxu0 (!%p322_p10), %v2261_v1  ;;  %1859 = vmatprep.subr.bf16.mxu1 (!%p322_p10), %v2261_v1  ;;  %v2094_v2 = vld [vmem:[%s2779_s3] sm:$0xff] (!%p322_p10)   ;;  %v2096_v4 = vld [vmem:[%s2779_s3 + $0x8] sm:$0xff] (!%p322_p10)   ;;  %p395_p13 = scmp.lt.s32.totalorder (!%p322_p10), %s2243_s24, 9  ;;  %v2097_v5 = vld [vmem:[%s2779_s3 + $0x50] sm:$0xff] (!%p322_p10)  }
  0x13   : > { %s2368_s15 = scalar_select %p217_p11, %s2239_s23, %s219_s13  }
  0x14   : > { %1840 = vmatpush3.bf16.msra.mxu0 (!%p322_p10), %v2093_v0  ;;  %1855 = vmatprep.mubr.msk.bf16.mxu0 (!%p322_p10), %vm2262_vm0, %v2261_v1  ;;  %v2098_v6 = vld [vmem:[%s2779_s3 + $0x10] sm:$0xff] (!%p322_p10)   ;;  %v2099_v7 = vld [vmem:[%s2779_s3 + $0x58] sm:$0xff] (!%p322_p10)   ;;  %v2101_v9 = vld [vmem:[%s2779_s3 + $0x60] sm:$0xff] (!%p322_p10)   ;;  %s402_s18 = sadd.s32 (!%p322_p10), 1, %s2243_s24  ;;  %p433_p2 = scmp.lt.s32.totalorder (!%p322_p10), %s2243_s24, 7 }
  0x15   : > { %1860 = vmatpush3.bf16.msra.mxu1 (!%p322_p10), %v2094_v2  ;;  %1841 = vmatprep.subr.bf16.mxu0 (!%p322_p10), %v2261_v1  ;;  %v2100_v8 = vld [vmem:[%s2779_s3 + $0x18] sm:$0xff] (!%p322_p10)   ;;  %v2102_v10 = vld [vmem:[%s2779_s3 + $0x20] sm:$0xff] (!%p322_p10)   ;;  %v2103_v15 = vld [vmem:[%s2779_s3 + $0x68] sm:$0xff] (!%p322_p10)   ;;  %p405_p0 = scmp.lt.s32.totalorder (!%p322_p10), %s402_s18, 9 }
  0x16   : > { %1861 = vmatprep.subr.bf16.mxu1 (!%p322_p10), %v2261_v1  ;;  %1875 = vmatprep.mubr.msk.bf16.mxu1 (!%p322_p10), %vm2262_vm0, %v2261_v1  ;;  %v2104_v16 = vld [vmem:[%s2779_s3 + $0x28] sm:$0xff] (!%p322_p10)   ;;  %v2105_v20 = vld [vmem:[%s2779_s3 + $0x70] sm:$0xff] (!%p322_p10)   ;;  %v2107_v25 = vld [vmem:[%s2779_s3 + $0x78] sm:$0xff] (!%p322_p10)  }
  0x17   : > { %v2106_v21 = vld [vmem:[%s2779_s3 + $0x30] sm:$0xff] (!%p322_p10)   ;;  %v2108_v26 = vld [vmem:[%s2779_s3 + $0x38] sm:$0xff] (!%p322_p10)   ;;  %v2109_v28 = vld [vmem:[%s2779_s3 + $0x80] sm:$0xff] (!%p322_p10)  }
  0x18   : > { %1842 = vmatpush3.bf16.msra.mxu0 (!%p322_p10), %v2095_v3  ;;  %v2110_v29 = vld [vmem:[%s2779_s3 + $0xc0] sm:$0xff] (!%p322_p10)   ;;  %v2111_v30 = vld [vmem:[%s2779_s3 + $0x88] sm:$0xff] (!%p322_p10)   ;;  %v2113_v32 = vld [vmem:[%s2779_s3 + $0x90] sm:$0xff] (!%p322_p10)  }
  0x19   : > { %s2391_s12 = scalar_select %p393_p12, %s2247_s25, 1  ;;  %1862 = vmatpush3.bf16.msra.mxu1 %v2096_v4  ;;  %1843 = vmatprep.subr.bf16.mxu0 %v2261_v1  ;;  %v2112_v31 = vld [vmem:[%s2779_s3 + $0xc8] sm:$0xff]   ;;  %v2114_v33 = vld [vmem:[%s2779_s3 + $0xd0] sm:$0xff]   ;;  %v2115_v34 = vld [vmem:[%s2779_s3 + $0x98] sm:$0xff]  }
  0x1a   : > { %s396_s13 = scalar_select %p395_p13, %s2243_s24, 9  ;;  %1863 = vmatprep.subr.bf16.mxu1 %v2261_v1  ;;  %v2116_v35 = vld [vmem:[%s2779_s3 + $0xd8] sm:$0xff]   ;;  %v2117_v36 = vld [vmem:[%s2779_s3 + $0xa0] sm:$0xff]   ;;  %v2119_v38 = vld [vmem:[%s2779_s3 + $0xa8] sm:$0xff]  }
  0x1b   : > { %s2400_s17 = smul.u32 20, %s2391_s12  ;;  %s2805_s18 = smov (!%p405_p0, %s402_s18), 9  ;;  %v2118_v37 = vld [vmem:[%s2779_s3 + $0xe0] sm:$0xff]   ;;  %v2120_v39 = vld [vmem:[%s2779_s3 + $0xe8] sm:$0xff]   ;;  %v2121_v40 = vld [vmem:[%s2779_s3 + $0xb0] sm:$0xff]  }
  0x1c   : > { %s1669_s20 = sshll.u32 %s396_s13, 1  ;;  %1844 = vmatpush3.bf16.msra.mxu0 %v2097_v5  ;;  %v2122_v41 = vld [vmem:[%s2779_s3 + $0xf0] sm:$0xff]   ;;  %v2123_v43 = vld [vmem:[%s2779_s3 + $0xb8] sm:$0xff]   ;;  %v2125_v47 = vld [vmem:[%s2779_s3 + $0x100] sm:$0xff]   ;;  %s1675_s13 = sshll.u32 %s2391_s12, 3 }
  0x1d   : > { %s399_s29 = sadd.s32 %s2400_s17, %s1669_s20  ;;  %1864 = vmatpush3.bf16.msra.mxu1 %v2098_v6  ;;  %1845 = vmatprep.subr.bf16.mxu0 %v2261_v1  ;;  %s1671_s20 = sshll.u32 %s2805_s18, 1  ;;  %v2124_v44 = vld [vmem:[%s2779_s3 + $0xf8] sm:$0xff]   ;;  %v2126_v49 = vld [vmem:[%s2779_s3 + $0x140] sm:$0xff]   ;;  %v2127_v50 = vld [vmem:[%s2779_s3 + $0x108] sm:$0xff]  }
  0x1e   : > { %s1670_s14 = sshll.u32 %s399_s29, 2  ;;  %1865 = vmatprep.subr.bf16.mxu1 %v2261_v1  ;;  %s409_s7 = sadd.s32 %s2400_s17, %s1671_s20  ;;  %v2128_v51 = vld [vmem:[%s2779_s3 + $0x148] sm:$0xff]   ;;  %v2129_v53 = vld [vmem:[%s2779_s3 + $0x110] sm:$0xff]   ;;  %v2131_v56 = vld [vmem:[%s2779_s3 + $0x118] sm:$0xff]  }
  0x1f   : > { %s401_s19 = scalar_lea.vmem %s2776_s0, %s1670_s14  ;;  %s1672_s18 = sshll.u32 %s409_s7, 2  ;;  %v2130_v54 = vld [vmem:[%s2779_s3 + $0x150] sm:$0xff]   ;;  %v2132_v57 = vld [vmem:[%s2779_s3 + $0x158] sm:$0xff]   ;;  %v2133_v59 = vld [vmem:[%s2779_s3 + $0x120] sm:$0xff]  }
  0x20   : > { %1846 = vmatpush3.bf16.msra.mxu0 %v2099_v7  ;;  %v444_v11 = vld [vmem:[%s401_s19] sm:$0xf]  ;;  %v445_v12 = vld [vmem:[%s401_s19 + $0x4] sm:$0x1]  ;;  %s2512_s20 = scalar_lea.vmem %s2777_s1, %s1672_s18  ;;  %s413_s19 = sadd.s32 2, %s2243_s24  ;;  %v2135_v62 = vld [vmem:[%s2779_s3 + $0x128] sm:$0xff]  }
  0x21   : > { %1866 = vmatpush3.bf16.msra.mxu1 %v2100_v8  ;;  %1847 = vmatprep.subr.bf16.mxu0 %v2261_v1  ;;  %vm446_vm1 = vcmp.ge.bf16.partialorder %v444_v11, 0  ;;  %vm447_vm2 = vcmp.ge.bf16.partialorder %v445_v12, 0  ;;  %v448_v13 = vmul.bf16 1045249613, %v444_v11  ;;  %v449_v14 = vmul.bf16 1045249613, %v445_v12 }
  0x22   : > { %1867 = vmatprep.subr.bf16.mxu1 %v2261_v1  ;;  %v780_v42 = vld [vmem:[%s2512_s20] sm:$0xf]  ;;  %v781_v52 = vld [vmem:[%s2512_s20 + $0x4] sm:$0x1]  ;;  %v2136_v63 = vld [vmem:[%s2779_s3 + $0x168] sm:$0xff]   ;;  %p416_p1 = scmp.lt.s32.totalorder %s413_s19, 9 }
  0x23   : > { %v450_v17 = vsel %vm446_vm1, %v444_v11, %v448_v13  ;;  %v451_v18 = vsel %vm447_vm2, %v445_v12, %v449_v14  ;;  %v784_v45 = vmul.bf16 1045249613, %v780_v42  ;;  %vm782_vm3 = vcmp.ge.bf16.partialorder %v780_v42, 0  ;;  %v2134_v60 = vld [vmem:[%s2779_s3 + $0x160] sm:$0xff]   ;;  %v2137_v2 = vld [vmem:[%s2779_s3 + $0x130] sm:$0xff]   ;;  %v2139_v6 = vld [vmem:[%s2779_s3 + $0x138] sm:$0xff]  }
  0x24   : > { %1848 = vmatpush3.bf16.msra.mxu0 %v2101_v9  ;;  %v2435_v19 = vcombine.low %v450_v17, %v451_v18  ;;  %v785_v55 = vmul.bf16 1045249613, %v781_v52  ;;  %vm783_vm4 = vcmp.ge.bf16.partialorder %v781_v52, 0  ;;  %v2138_v3 = vld [vmem:[%s2779_s3 + $0x170] sm:$0xff]   ;;  %s2807_s19 = smov (!%p416_p1, %s413_s19), 9  ;;  %v2140_v7 = vld [vmem:[%s2779_s3 + $0x178] sm:$0xff]  }
  0x25   : > { %1868 = vmatpush3.bf16.msra.mxu1 %v2102_v10  ;;  %1849 = vmatprep.subr.bf16.mxu0 %v2261_v1  ;;  %v786_v48 = vsel %vm782_vm3, %v780_v42, %v784_v45  ;;  %s1673_s20 = sshll.u32 %s2807_s19, 1  ;;  %v2141_v9 = vld [vmem:[%s2779_s3 + $0x180] sm:$0xff]   ;;  %v2143_v12 = vld [vmem:[%s2779_s3 + $0x188] sm:$0xff]   ;;  %v2145_v14 = vld [vmem:[%s2779_s3 + $0x190] sm:$0xff]   ;;  %s1754_s7 = sshll.u32 %s2247_s25, 3 }
  0x26   : > { %1869 = vmatprep.subr.bf16.mxu1 %v2261_v1  ;;  %v492_v22 = vshll.u32 %v2435_v19, 16  ;;  %v490_v23 = vshrl.u32 %v2435_v19, 16  ;;  %v689_v46 = vrot.slane %v2435_v19, 1  ;;  %v787_v58 = vsel %vm783_vm4, %v781_v52, %v785_v55  ;;  %v2142_v11 = vld [vmem:[%s2779_s3 + $0x1c0] sm:$0xff]   ;;  %s420_s16 = sadd.s32 %s2400_s17, %s1673_s20  ;;  %v2144_v13 = vld [vmem:[%s2779_s3 + $0x1c8] sm:$0xff]   ;;  %v2147_v18 = vld [vmem:[%s2779_s3 + $0x198] sm:$0xff]   ;;  %s1482_s12 = sadd.s32 %s2243_s24, %s1754_s7 }
  0x27   : > { %v1710_v61 = vcombine.low %v786_v48, %v787_v58  ;;  %s1674_s18 = sshll.u32 %s420_s16, 2  ;;  %v2148_v19 = vld [vmem:[%s2779_s3 + $0x1d8] sm:$0xff]   ;;  %v2162_v42 = vld [vmem:[%s2779_s3 + $0x228] sm:$0xff]  }
  0x28   : > { %1850 = vmatpush3.bf16.msra.mxu0 %v2103_v15  ;;  %v494_v24 = vrot.slane %v492_v22, 1  ;;  %s422_s8 = scalar_lea.vmem %s2778_s2, %s1674_s18  ;;  %v2146_v15 = vld [vmem:[%s2779_s3 + $0x1d0] sm:$0xff]   ;;  %v2149_v22 = vld [vmem:[%s2779_s3 + $0x1a0] sm:$0xff]  }
  0x29   : > { %1870 = vmatpush3.bf16.msra.mxu1 %v2104_v16  ;;  %1851 = vmatprep.subr.bf16.mxu0 %v2261_v1  ;;  %v917_v0 = vshll.u32 %v1710_v61, 16  ;;  %v915_v4 = vshrl.u32 %v1710_v61, 16  ;;  %v1027_v10 = vrot.slane %v1710_v61, 1  ;;  %v1118_v16 = vld [vmem:[%s422_s8] sm:$0xf]  ;;  %s434_s19 = scalar_select %p433_p2, %s2243_s24, 7 }
  0x2a   : > { %1871 = vmatprep.subr.bf16.mxu1 %v2261_v1  ;;  %v495_v27 = vor.u32 %v494_v24, %v490_v23  ;;  %vm1120_vm5 = vcmp.ge.bf16.partialorder %v1118_v16, 0  ;;  %v2150_v23 = vld [vmem:[%s2779_s3 + $0x1e0] sm:$0xff]  }
  0x2b   : > { %v919_v5 = vrot.slane %v917_v0, 1  ;;  %s439_s18 = sadd.s32 %s1675_s13, %s434_s19  ;;  %s1755_s19 = sshll.u32 %s1482_s12, 7 }
  0x2c   : > { %1852 = vmatpush3.bf16.msra.mxu0 %v2105_v20  ;;  %v1122_v20 = vmul.bf16 1045249613, %v1118_v16  ;;  %s1676_s29 = sshll.u32 %s439_s18, 2  ;;  %s2723_s30 = scalar_lea.hbm %s2782_s6, %s1755_s19 }
  0x2d   : > { %1872 = vmatpush3.bf16.msra.mxu1 %v2106_v21  ;;  %1853 = vmatprep.subr.bf16.mxu0 %v2261_v1  ;;  %v920_v8 = vor.u32 %v919_v5, %v915_v4  ;;  %s441_s20 = scalar_lea.vmem %s2781_s5, %s1676_s29 }
  0x2e   : > { %1873 = vmatprep.subr.bf16.mxu1 %v2261_v1  ;;  %v1124_v24 = vsel %vm1120_vm5, %v1118_v16, %v1122_v20 }
  0x30   : > { %1854 = vmatpush3.bf16.msra.mxu0 %v2107_v25 }
  0x31   : > { %1874 = vmatpush3.bf16.msra.mxu1 %v2108_v26  ;;  %1879 = vmatprep.subr.bf16.mxu0 %v2261_v1  ;;  %v2151_v26 = vld [vmem:[%s2779_s3 + $0x1a8] sm:$0xff]  }
  0x32   : > { %1899 = vmatprep.subr.bf16.mxu1 %v2261_v1 }
  0x33   : > { %1856 = vmatmul.mubr.bf16.vlgmr.msra.gmra.mrb[0].mxu0 %v495_v27 }
  0x34   : > { %1876 = vmatmul.mubr.bf16.vlgmr.msra.gmra.mrb[0].mxu1 %v450_v17  ;;  %1880 = vmatpush3.bf16.msra.mxu0 %v2109_v28  ;;  %v1119_v17 = vld [vmem:[%s422_s8 + $0x4] sm:$0x1]  ;;  %v2152_v28 = vld [vmem:[%s2779_s3 + $0x1e8] sm:$0xff]   ;;  %s390_s8 = sand.u32 1, %s2235_s22  }
  0x35   : > { %1900 = vmatpush3.bf16.msra.mxu1 %v2110_v29  ;;  %1881 = vmatprep.subr.bf16.mxu0 %v2261_v1  ;;  %v1123_v21 = vmul.bf16 1045249613, %v1119_v17  ;;  %vm1121_vm6 = vcmp.ge.bf16.partialorder %v1119_v17, 0  ;;  %v2153_v29 = vld [vmem:[%s2779_s3 + $0x1b0] sm:$0xff]   ;;  %s1668_s9 = sshll.u32 %s390_s8, 3  ;;  %s1470_s24 = scalar_lea.sflag [#allocation3], %s390_s8 }
  0x36   : > { %1901 = vmatprep.subr.bf16.mxu1 %v2261_v1  ;;  %1895 = vmatprep.mubr.msk.bf16.mxu0 %vm2262_vm0, %v2261_v1  ;;  %s392_s13 = scalar_lea.vmem [#allocation2], %s1668_s9 }
  0x37   : > { %1915 = vmatprep.mubr.msk.bf16.mxu1 %vm2262_vm0, %v2261_v1  ;;  %v1125_v25 = vsel %vm1121_vm6, %v1119_v17, %v1123_v21  ;;  %v1464_v21 = vld [vmem:[%s441_s20] sm:$0xf]  ;;  %s1486_s18 = sshll.u32 %s392_s13, 4  ;;  %s2263_s20 = smov [#allocation2]   ;;  %s2725_s18 = int_to_ptr.vmem [resolvable:$true] %s1486_s18 }
  0x38   : > { %1882 = vmatpush3.bf16.msra.mxu0 %v2111_v30  ;;  %v1735_v27 = vcombine.low %v1124_v24, %v1125_v25  ;;  %v1465_v25 = vunpack.c.l.bf16 %v1464_v21  ;;  %s2165_s17 = scalar_lea.vmem %s2725_s18, 128  ;;  %s2169_s9 = sshll.u32 %s2263_s20, 4  ;;  %s2170_s9 = int_to_ptr.vmem [resolvable:$false] %s2169_s9 }
  0x39   : > { %1902 = vmatpush3.bf16.msra.mxu1 %v2112_v31  ;;  %1883 = vmatprep.subr.bf16.mxu0 %v2261_v1  ;;  %v2154_v31 = vld [vmem:[%s2779_s3 + $0x1f0] sm:$0xff]   ;;  %p2166_p4 = scmp.ne.s32.totalorder %s2725_s18, %s2165_s17  ;;  %s2171_s7 = scalar_lea.vmem %s2170_s9, 256 }
  0x3a   : > { %1903 = vmatprep.subr.bf16.mxu1 %v2261_v1  ;;  %v1255_v30 = vshll.u32 %v1735_v27, 16  ;;  %v1365_v45 = vrot.slane %v1735_v27, 1  ;;  %p2172_p7 = scmp.lt.s32.totalorder %s2725_s18, %s2170_s9  ;;  %p2173_p9 = scmp.lt.s32.totalorder %s2171_s7, %s2165_s17 }
  0x3b   : > { %p2167_p5 = pnand %p2166_p4, %p2350_p3 }
  0x3c   : > { %1884 = vmatpush3.bf16.msra.mxu0 %v2113_v32  ;;  %v2155_v32 = vld [vmem:[%s2779_s3 + $0x1b8] sm:$0xff]   ;;  %p2174_p10 = por %p2173_p9, %p2172_p7 }
  0x3d   : > { %1904 = vmatpush3.bf16.msra.mxu1 %v2114_v33  ;;  %1885 = vmatprep.subr.bf16.mxu0 %v2261_v1  ;;  %v1253_v33 = vshrl.u32 %v1735_v27, 16  ;;  %p2168_p6 = pneg %p2167_p5 }
  0x3e   : > { %1905 = vmatprep.subr.bf16.mxu1 %v2261_v1 }
  0x3f   : > { %p2175_p11 = pnand %p2174_p10, %p2168_p6 }
  0x40   : > { %1886 = vmatpush3.bf16.msra.mxu0 %v2115_v34  ;;  %v1257_v34 = vrot.slane %v1255_v30, 1 }
  0x41   : > { %1906 = vmatpush3.bf16.msra.mxu1 %v2116_v35  ;;  %1887 = vmatprep.subr.bf16.mxu0 %v2261_v1  ;;  %v2156_v35 = vld [vmem:[%s2779_s3 + $0x1f8] sm:$0xff]  }
  0x42   : > { %1907 = vmatprep.subr.bf16.mxu1 %v2261_v1 }
  0x44   : > { %1888 = vmatpush3.bf16.msra.mxu0 %v2117_v36  ;;  %v2157_v36 = vld [vmem:[%s2779_s3 + $0x200] sm:$0xff]  }
  0x45   : > { %1908 = vmatpush3.bf16.msra.mxu1 %v2118_v37  ;;  %1889 = vmatprep.subr.bf16.mxu0 %v2261_v1  ;;  %v1258_v37 = vor.u32 %v1257_v34, %v1253_v33 }
  0x46   : > { %1909 = vmatprep.subr.bf16.mxu1 %v2261_v1 }
  0x48   : > { %1890 = vmatpush3.bf16.msra.mxu0 %v2119_v38  ;;  %v2158_v38 = vld [vmem:[%s2779_s3 + $0x208] sm:$0xff]  }
  0x49   : > { %1910 = vmatpush3.bf16.msra.mxu1 %v2120_v39  ;;  %1891 = vmatprep.subr.bf16.mxu0 %v2261_v1  ;;  %v2159_v39 = vld [vmem:[%s2779_s3 + $0x210] sm:$0xff]  }
  0x4a   : > { %1911 = vmatprep.subr.bf16.mxu1 %v2261_v1 }
  0x4c   : > { %1892 = vmatpush3.bf16.msra.mxu0 %v2121_v40  ;;  %v2160_v40 = vld [vmem:[%s2779_s3 + $0x218] sm:$0xff]  }
  0x4d   : > { %1912 = vmatpush3.bf16.msra.mxu1 %v2122_v41  ;;  %1893 = vmatprep.subr.bf16.mxu0 %v2261_v1  ;;  %v2161_v41 = vld [vmem:[%s2779_s3 + $0x220] sm:$0xff]  }
  0x4e   : > { %1913 = vmatprep.subr.bf16.mxu1 %v2261_v1 }
  0x50   : > { %1894 = vmatpush3.bf16.msra.mxu0 %v2123_v43  ;;  %v2163_v43 = vld [vmem:[%s2779_s3 + $0x230] sm:$0xff]  }
  0x51   : > { %1914 = vmatpush3.bf16.msra.mxu1 %v2124_v44  ;;  %1919 = vmatprep.subr.bf16.mxu0 %v2261_v1  ;;  %v2164_v44 = vld [vmem:[%s2779_s3 + $0x238] sm:$0xff]  }
  0x52   : > { %1939 = vmatprep.subr.bf16.mxu1 %v2261_v1 }
  0x53   : > { %1896 = vmatmul.mubr.bf16.vlgmr.msra.gmra.mrb[4].mxu0 %v689_v46 }
  0x54   : > { %1920 = vmatpush3.bf16.msra.mxu0 %v2125_v47  ;;  %1916 = vmatmul.mubr.bf16.vlgmr.msra.gmra.mrb[4].mxu1 %v786_v48 }
  0x55   : > { %1940 = vmatpush3.bf16.msra.mxu1 %v2126_v49  ;;  %1921 = vmatprep.subr.bf16.mxu0 %v2261_v1 }
  0x56   : > { %1941 = vmatprep.subr.bf16.mxu1 %v2261_v1  ;;  %1935 = vmatprep.mubr.msk.bf16.mxu0 %vm2262_vm0, %v2261_v1 }
  0x57   : > { %1955 = vmatprep.mubr.msk.bf16.mxu1 %vm2262_vm0, %v2261_v1 }
  0x58   : > { %1922 = vmatpush3.bf16.msra.mxu0 %v2127_v50 }
  0x59   : > { %1942 = vmatpush3.bf16.msra.mxu1 %v2128_v51  ;;  %1923 = vmatprep.subr.bf16.mxu0 %v2261_v1 }
  0x5a   : > { %1943 = vmatprep.subr.bf16.mxu1 %v2261_v1 }
  0x5c   : > { %1924 = vmatpush3.bf16.msra.mxu0 %v2129_v53 }
  0x5d   : > { %1944 = vmatpush3.bf16.msra.mxu1 %v2130_v54  ;;  %1925 = vmatprep.subr.bf16.mxu0 %v2261_v1 }
  0x5e   : > { %1945 = vmatprep.subr.bf16.mxu1 %v2261_v1 }
  0x60   : > { %1926 = vmatpush3.bf16.msra.mxu0 %v2131_v56 }
  0x61   : > { %1946 = vmatpush3.bf16.msra.mxu1 %v2132_v57  ;;  %1927 = vmatprep.subr.bf16.mxu0 %v2261_v1 }
  0x62   : > { %1947 = vmatprep.subr.bf16.mxu1 %v2261_v1 }
  0x64   : > { %1928 = vmatpush3.bf16.msra.mxu0 %v2133_v59 }
  0x65   : > { %1948 = vmatpush3.bf16.msra.mxu1 %v2134_v60  ;;  %1929 = vmatprep.subr.bf16.mxu0 %v2261_v1 }
  0x66   : > { %1949 = vmatprep.subr.bf16.mxu1 %v2261_v1 }
  0x68   : > { %1930 = vmatpush3.bf16.msra.mxu0 %v2135_v62 }
  0x69   : > { %1950 = vmatpush3.bf16.msra.mxu1 %v2136_v63  ;;  %1931 = vmatprep.subr.bf16.mxu0 %v2261_v1 }
  0x6a   : > { %1951 = vmatprep.subr.bf16.mxu1 %v2261_v1 }
  0x6c   : > { %1932 = vmatpush3.bf16.msra.mxu0 %v2137_v2 }
  0x6d   : > { %1952 = vmatpush3.bf16.msra.mxu1 %v2138_v3  ;;  %1933 = vmatprep.subr.bf16.mxu0 %v2261_v1 }
  0x6e   : > { %1953 = vmatprep.subr.bf16.mxu1 %v2261_v1 }
  0x70   : > { %1934 = vmatpush3.bf16.msra.mxu0 %v2139_v6 }
  0x71   : > { %1954 = vmatpush3.bf16.msra.mxu1 %v2140_v7  ;;  %1959 = vmatprep.subr.bf16.mxu0 %v2261_v1 }
  0x72   : > { %1979 = vmatprep.subr.bf16.mxu1 %v2261_v1 }
  0x73   : > { %1936 = vmatmul.mubr.bf16.vlgmr.msra.gmra.mrb[8].mxu0 %v920_v8 }
  0x74   : > { %1960 = vmatpush3.bf16.msra.mxu0 %v2141_v9  ;;  %1956 = vmatmul.mubr.bf16.vlgmr.msra.gmra.mrb[8].mxu1 %v1027_v10 }
  0x75   : > { %1980 = vmatpush3.bf16.msra.mxu1 %v2142_v11  ;;  %1961 = vmatprep.subr.bf16.mxu0 %v2261_v1 }
  0x76   : > { %1981 = vmatprep.subr.bf16.mxu1 %v2261_v1  ;;  %1975 = vmatprep.mubr.msk.bf16.mxu0 %vm2262_vm0, %v2261_v1 }
  0x77   : > { %1995 = vmatprep.mubr.msk.bf16.mxu1 %vm2262_vm0, %v2261_v1 }
  0x78   : > { %1962 = vmatpush3.bf16.msra.mxu0 %v2143_v12 }
  0x79   : > { %1982 = vmatpush3.bf16.msra.mxu1 %v2144_v13  ;;  %1963 = vmatprep.subr.bf16.mxu0 %v2261_v1 }
  0x7a   : > { %1983 = vmatprep.subr.bf16.mxu1 %v2261_v1 }
  0x7c   : > { %1964 = vmatpush3.bf16.msra.mxu0 %v2145_v14 }
  0x7d   : > { %1984 = vmatpush3.bf16.msra.mxu1 %v2146_v15  ;;  %1965 = vmatprep.subr.bf16.mxu0 %v2261_v1 }
  0x7e   : > { %1985 = vmatprep.subr.bf16.mxu1 %v2261_v1 }
  0x80   : > { %1966 = vmatpush3.bf16.msra.mxu0 %v2147_v18 }
  0x81   : > { %1986 = vmatpush3.bf16.msra.mxu1 %v2148_v19  ;;  %1967 = vmatprep.subr.bf16.mxu0 %v2261_v1 }
  0x82   : > { %1987 = vmatprep.subr.bf16.mxu1 %v2261_v1 }
  0x84   : > { %1968 = vmatpush3.bf16.msra.mxu0 %v2149_v22 }
  0x85   : > { %1988 = vmatpush3.bf16.msra.mxu1 %v2150_v23  ;;  %1969 = vmatprep.subr.bf16.mxu0 %v2261_v1  ;;  %v1752_v23 = vld [vmem:[%s2780_s4] ss:$0 sm:$0xff] }
  0x86   : > { %1989 = vmatprep.subr.bf16.mxu1 %v2261_v1 }
  0x88   : > { %1970 = vmatpush3.bf16.msra.mxu0 %v2151_v26 }
  0x89   : > { %1990 = vmatpush3.bf16.msra.mxu1 %v2152_v28  ;;  %1971 = vmatprep.subr.bf16.mxu0 %v2261_v1 }
  0x8a   : > { %1991 = vmatprep.subr.bf16.mxu1 %v2261_v1 }
  0x8c   : > { %1972 = vmatpush3.bf16.msra.mxu0 %v2153_v29 }
  0x8d   : > { %1992 = vmatpush3.bf16.msra.mxu1 %v2154_v31  ;;  %1973 = vmatprep.subr.bf16.mxu0 %v2261_v1 }
  0x8e   : > { %1993 = vmatprep.subr.bf16.mxu1 %v2261_v1 }
  0x90   : > { %1974 = vmatpush3.bf16.msra.mxu0 %v2155_v32 }
  0x91   : > { %1994 = vmatpush3.bf16.msra.mxu1 %v2156_v35  ;;  %1999 = vmatprep.subr.bf16.mxu0 %v2261_v1 }
  0x93   : > { %1976 = vmatmul.mubr.bf16.vlgmr.msra.gmra.mrb[12].mxu0 %v1124_v24 }
  0x94   : > { %2000 = vmatpush3.bf16.msra.mxu0 %v2157_v36  ;;  %1996 = vmatmul.mubr.bf16.vlgmr.msra.gmra.mrb[12].mxu1 %v1258_v37 }
  0x95   : > { %2001 = vmatprep.subr.bf16.mxu0 %v2261_v1  ;;  %2015 = vmatprep.mubr.msk.bf16.mxu0 %vm2262_vm0, %v2261_v1 }
  0x98   : > { %2002 = vmatpush3.bf16.msra.mxu0 %v2158_v38 }
  0x99   : > { %2003 = vmatprep.subr.bf16.mxu0 %v2261_v1 }
  0x9c   : > { %2004 = vmatpush3.bf16.msra.mxu0 %v2159_v39 }
  0x9d   : > { %2005 = vmatprep.subr.bf16.mxu0 %v2261_v1 }
  0xa0   : > { %2006 = vmatpush3.bf16.msra.mxu0 %v2160_v40 }
  0xa1   : > { %2007 = vmatprep.subr.bf16.mxu0 %v2261_v1 }
  0xa4   : > { %2008 = vmatpush3.bf16.msra.mxu0 %v2161_v41 }
  0xa5   : > { %2009 = vmatprep.subr.bf16.mxu0 %v2261_v1 }
  0xa8   : > { %2010 = vmatpush3.bf16.msra.mxu0 %v2162_v42 }
  0xa9   : > { %2011 = vmatprep.subr.bf16.mxu0 %v2261_v1 }
  0xac   : > { %2012 = vmatpush3.bf16.msra.mxu0 %v2163_v43 }
  0xad   : > { %2013 = vmatprep.subr.bf16.mxu0 %v2261_v1 }
  0xb0   : > { %2014 = vmatpush3.bf16.msra.mxu0 %v2164_v44 }
  0xb3   : > { %2016 = vmatmul.mubr.bf16.vlgmr.msra.gmra.mrb[16].mxu0 %v1365_v45 }
 0x106   : > { %v579_v46 = vpop.f32.mrb[0].mxu0 }
 0x107   : > { %v1857_v47 = vpop.f32.mrb[1].mxu0  ;;  %v667_v48 = vpop.f32.mrb[0].mxu1 }
 0x108   : > { %v668_v49 = vadd.f32 %v667_v48, %v579_v46  ;;  %v582_v50 = vpop.f32.mrb[2].mxu0  ;;  %v1877_v51 = vpop.f32.mrb[1].mxu1 }
 0x109   : > { %v1858_v52 = vpop.f32.mrb[3].mxu0  ;;  %v670_v53 = vpop.f32.mrb[2].mxu1 }
 0x10a   : > { %v1878_v54 = vpop.f32.mrb[3].mxu1 }
 0x126   : > { %v773_v55 = vpop.f32.mrb[4].mxu0 }
 0x127   : > { %v779_v56 = vadd.f32 %v773_v55, %v668_v49  ;;  %v1897_v57 = vpop.f32.mrb[5].mxu0  ;;  %v886_v58 = vpop.f32.mrb[4].mxu1 }
 0x128   : > { %v776_v59 = vpop.f32.mrb[6].mxu0  ;;  %v1917_v60 = vpop.f32.mrb[5].mxu1 }
 0x129   : > { %v892_v61 = vadd.f32 %v886_v58, %v779_v56  ;;  %v1898_v1 = vpop.f32.mrb[7].mxu0  ;;  %v889_v62 = vpop.f32.mrb[6].mxu1 }
 0x12a   : > { %v1918_v63 = vpop.f32.mrb[7].mxu1 }
 0x146   : > { %v1004_v0 = vpop.f32.mrb[8].mxu0 }
 0x147   : > { %v1010_v2 = vadd.f32 %v1004_v0, %v892_v61  ;;  %v1937_v3 = vpop.f32.mrb[9].mxu0  ;;  %v1111_v4 = vpop.f32.mrb[8].mxu1 }
 0x148   : > { %v1007_v5 = vpop.f32.mrb[10].mxu0  ;;  %v1957_v6 = vpop.f32.mrb[9].mxu1 }
 0x149   : > { %v1117_v7 = vadd.f32 %v1111_v4, %v1010_v2  ;;  %v1938_v8 = vpop.f32.mrb[11].mxu0  ;;  %v1114_v9 = vpop.f32.mrb[10].mxu1 }
 0x14a   : > { %v1958_v10 = vpop.f32.mrb[11].mxu1 }
 0x166   : > { %v1224_v11 = vpop.f32.mrb[12].mxu0 }
 0x167   : > { %v1230_v12 = vadd.f32 %v1224_v11, %v1117_v7  ;;  %v1977_v13 = vpop.f32.mrb[13].mxu0  ;;  %v1342_v14 = vpop.f32.mrb[12].mxu1 }
 0x168   : > { %v1227_v15 = vpop.f32.mrb[14].mxu0  ;;  %v1997_v16 = vpop.f32.mrb[13].mxu1 }
 0x169   : > { %v1348_v17 = vadd.f32 %v1342_v14, %v1230_v12  ;;  %v1978_v18 = vpop.f32.mrb[15].mxu0  ;;  %v1345_v19 = vpop.f32.mrb[14].mxu1 }
 0x16a   : > { %v1998_v20 = vpop.f32.mrb[15].mxu1 }
 0x186   : > { %v1449_v22 = vpop.f32.mrb[16].mxu0 }
 0x187   : > { %v1455_v24 = vadd.f32 %v1449_v22, %v1348_v17  ;;  %v2017_v26 = vpop.f32.mrb[17].mxu0 }
 0x188   : > { %v1452_v27 = vpop.f32.mrb[18].mxu0 }
 0x189   : > { %v1463_v28 = vadd.f32 %v1752_v23, %v1455_v24  ;;  %v2018_v29 = vpop.f32.mrb[19].mxu0 }
 0x18b   : > { %v1466_v30 = vadd.f32 %v1465_v25, %v1463_v28 }
 0x18d   : > { %v1467_v31 = vmul.f32 0.70710677, %v1466_v30 }
 0x18f   : > { %1468 = vst [vmem:[%s392_s13] sm:$0xff] %v1467_v31 }
 0x190   : > { %2178 = shalt.err (!%p2175_p11)
}
 0x191   : > { %s2179_s8 = scalar_lea.hbm %s2723_s30, 128  ;;  %s2183_s12 = scalar_lea.hbm %s2782_s6, 2048 }
 0x192   : > { %p2180_p12 = scmp.ne.s32.totalorder %s2723_s30, %s2179_s8  ;;  %p2184_p1 = scmp.lt.u32.totalorder %s2723_s30, %s2782_s6 }
 0x193   : > { %p2185_p2 = scmp.lt.u32.totalorder %s2183_s12, %s2179_s8  ;;  %p2187_p5 = scmp.lt.u32.totalorder %s2179_s8, %s2723_s30 }
 0x194   : > { %p2181_p13 = pnand %p2180_p12, %p2350_p3 }
 0x195   : > { %p2186_p4 = por %p2185_p2, %p2184_p1 }
 0x196   : > { %p2182_p0 = pneg %p2181_p13 }
 0x197   : > { %p2188_p6 = por %p2187_p5, %p2186_p4 }
 0x199   : > { %p2189_p7 = pnand %p2188_p6, %p2182_p0 }
 0x19b   : > { %2192 = shalt.err (!%p2189_p7)
}
 0x19c   : > { %2020 = dma.vmem_to_hbm [thread:$0]  (%p2350_p3), %s2725_s18, 128, %s2723_s30, %s1470_s24  }
 0x19d PF: > { %p2026_p9 = scmp.ge.s32.totalorder %s2259_s28, 2  ;;  %s1498_s29 = sand.u32 1, %s2231_s21  }
 0x19e   : > { %s1499_s25 = scalar_lea.sflag [#allocation3], %s1498_s29 }
 0x19f   : > { %p2023_p10 = pnand %p2026_p9, %p2359_p8 }
 0x1a1   : > { %2226 = dma.done.wait (!%p2023_p10), %s1499_s25, 128  }
 0x1a2   : > { %2228 = vsyncadd (!%p2023_p10), %s1499_s25, 4294967168  ;;  %s19_s28 = sadd.s32 1, %s2259_s28   ;;  %s2789_s10 = sld [smem:[#allocation5_spill]] }
 0x1a3   : > { %p16_p11 = scmp.ge.s32.totalorder %s19_s28, 18   ;;  %s2790_s18 = sld [smem:[#allocation6_spill]] }
 0x1a4   : > { %s2791_s21 = smov %s2235_s22  ;;  %s2792_s22 = smov %s2239_s23 }
 0x1a5   : > { %s2793_s23 = smov %s2368_s15  ;;  %s2794_s24 = smov %s2251_s26 }
 0x1a6   : > { %s2795_s25 = smov %s2255_s27  ;;  %18 = sbr.rel (!%p16_p11) target bundleno = 5 (0x5), region = 94 }
 0x1a8   : > { %s2796_s26 = smov %s2789_s10 }
 0x1a9   : > { %s2797_s27 = smov %s2790_s18 }
 0x1ad   :  { %1504 = vsyncpa [#allocation3], 1 }
 0x1ae   :  { %1506 = vsyncpa [#allocation3 + $0x1], 1 }

</bundles_post_ra>
